<compile_context>
chip_gen: v5e
topology: v5e:2x2
jax: 0.10.0
libtpu: 0.0.40
codegen_flags: <defaults>
</compile_context>

<pallas_src>
import functools

import jax
import jax.numpy as jnp
import numpy as np
from jax import lax
from jax.experimental import pallas as pl
from jax.experimental.pallas import tpu as pltpu


def _round_up(v, m):
    return (v + m - 1) // m * m


def _pad_to(a, shape):
    cfg = [(0, t - s) for s, t in zip(a.shape, shape)]
    if all(p == (0, 0) for p in cfg):
        return a
    return jnp.pad(a, cfg)


def _bottleneck_kernel(x_ref, w1_ref, s1_ref, b1_ref,
                       w2_ref, s2_ref, b2_ref,
                       w3_ref, s3_ref, b3_ref,
                       out_ref, h1_ref, acc_ref,
                       *, H, W, pad_lead, pad_trail):
    # x_ref:   (1, H, W, Cp_in)   f32 NHWC input block (one image)
    # w1_ref:  (Cp_in, Cp_w)      bf16
    # w2_ref:  (9, Cp_w, Cp_w)    bf16 (3x3 taps, row-major over (dy, dx))
    # w3_ref:  (Cp_w, Cp_out)     bf16
    # s*/b*:   (1, C)             f32 folded BN scale / bias
    # h1_ref:  (pad_lead + H*W + pad_trail, Cp_w) bf16 scratch (flattened + halo)
    # acc_ref: (H*W, Cp_w)        f32 conv2 accumulator scratch
    M = H * W
    Cp_in = x_ref.shape[-1]
    Cp_w = w1_ref.shape[1]
    Cp_out = w3_ref.shape[1]

    # Zero the halo rows once; they are never written again, so they stay zero
    # for every subsequent grid step (scratch persists across the grid).
    @pl.when(pl.program_id(0) == 0)
    def _():
        h1_ref[0:pad_lead, :] = jnp.zeros((pad_lead, Cp_w), h1_ref.dtype)
        h1_ref[pad_lead + M:pad_lead + M + pad_trail, :] = jnp.zeros(
            (pad_trail, Cp_w), h1_ref.dtype)

    x_flat = x_ref[...].reshape(M, Cp_in)              # f32, reused as residual

    # ---- conv1 (1x1) + bn1 + relu -> bf16 into scratch ----
    h1 = jnp.dot(x_flat.astype(jnp.bfloat16), w1_ref[...],
                 preferred_element_type=jnp.float32)
    h1 = jnp.maximum(h1 * s1_ref[...] + b1_ref[...], 0.0)
    h1_ref[pad_lead:pad_lead + M, :] = h1.astype(jnp.bfloat16)

    # ---- conv2 (3x3, stride=1, pad=1) + bn2 + relu ----
    # Flattened taps: out[m] += h1[m + dy*W + dx] @ w2[dy,dx].
    # Row (dy) out-of-bounds falls into the zero halo; column (dx) wrap-around
    # across image rows is killed with a cheap per-column mask.
    acc_ref[...] = jnp.zeros((M, Cp_w), jnp.float32)
    col = lax.broadcasted_iota(jnp.int32, (M, 1), 0) % W
    left_ok = col >= 1            # valid when reading column x-1
    right_ok = col <= (W - 2)     # valid when reading column x+1

    for dy in (-1, 0, 1):
        for dx in (-1, 0, 1):
            start = pad_lead + dy * W + dx
            tap = h1_ref[start:start + M, :]
            if dx == -1:
                tap = jnp.where(left_ok, tap, jnp.zeros_like(tap))
            elif dx == 1:
                tap = jnp.where(right_ok, tap, jnp.zeros_like(tap))
            k = (dy + 1) * 3 + (dx + 1)
            acc_ref[...] += jnp.dot(tap, w2_ref[k],
                                    preferred_element_type=jnp.float32)

    h2 = jnp.maximum(acc_ref[...] * s2_ref[...] + b2_ref[...], 0.0)

    # ---- conv3 (1x1) + bn3 + residual add + relu ----
    h3 = jnp.dot(h2.astype(jnp.bfloat16), w3_ref[...],
                 preferred_element_type=jnp.float32)
    h3 = h3 * s3_ref[...] + b3_ref[...]
    h3 = h3 + x_flat              # identity path (Cin == Cout, downsample=None)
    out_ref[...] = jnp.maximum(h3, 0.0).reshape(1, H, W, Cp_out)


def fold_bn(gamma, beta, mean, var, eps=1e-5):
    scale = gamma / jnp.sqrt(var + eps)
    bias = beta - mean * scale
    return scale.astype(jnp.float32), bias.astype(jnp.float32)


def bottleneck_forward(x_nchw, params):
    """x_nchw: (N, C, H, W) float32. Returns (N, C, H, W) float32."""
    N, Cin, H, W = x_nchw.shape
    w1 = params["w1"]           # (width, Cin, 1, 1)
    w2 = params["w2"]           # (width, width, 3, 3)
    w3 = params["w3"]           # (Cout, width, 1, 1)
    width = w1.shape[0]
    Cout = w3.shape[0]
    assert Cin == Cout, "downsample=None requires inplanes == planes * expansion"
    # TODO(synk): stride>1 / groups>1 / dilation>1 / downsample paths not implemented.

    # Lane-dense channel padding (channels live on the 128-wide lane dim).
    Cp_in = _round_up(Cin, 128)
    Cp_w = _round_up(width, 128)
    Cp_out = _round_up(Cout, 128)

    # NHWC input, channels zero-padded.
    # TODO(synk): keep surrounding model NHWC to drop these boundary transposes.
    x_nhwc = _pad_to(jnp.transpose(x_nchw, (0, 2, 3, 1)), (N, H, W, Cp_in))

    # Weights as channels-last matmul operands, zero-padded, bf16 for the MXU.
    w1m = _pad_to(jnp.transpose(w1[:, :, 0, 0], (1, 0)),
                  (Cp_in, Cp_w)).astype(jnp.bfloat16)
    w2m = _pad_to(jnp.transpose(w2, (2, 3, 1, 0)),
                  (3, 3, Cp_w, Cp_w)).reshape(9, Cp_w, Cp_w).astype(jnp.bfloat16)
    w3m = _pad_to(jnp.transpose(w3[:, :, 0, 0], (1, 0)),
                  (Cp_w, Cp_out)).astype(jnp.bfloat16)

    s1, b1 = fold_bn(*params["bn1"])
    s2, b2 = fold_bn(*params["bn2"])
    s3, b3 = fold_bn(*params["bn3"])
    s1 = _pad_to(s1[None, :], (1, Cp_w)); b1 = _pad_to(b1[None, :], (1, Cp_w))
    s2 = _pad_to(s2[None, :], (1, Cp_w)); b2 = _pad_to(b2[None, :], (1, Cp_w))
    s3 = _pad_to(s3[None, :], (1, Cp_out)); b3 = _pad_to(b3[None, :], (1, Cp_out))

    # Scratch layout for the flattened 3x3 conv (aligned interior, zero halo).
    M = H * W
    pad_lead = _round_up(W + 1, 8)
    pad_trail = pad_lead
    h1_rows = pad_lead + M + pad_trail

    # VMEM budget: double-buffered blocks + resident weights + scratch + slack.
    bytes_x = H * W * Cp_in * 4
    bytes_out = H * W * Cp_out * 4
    bytes_w = 2 * (Cp_in * Cp_w + 9 * Cp_w * Cp_w + Cp_w * Cp_out)
    bytes_scr = h1_rows * Cp_w * 2 + M * Cp_w * 4
    est = 2 * (bytes_x + bytes_out + bytes_w) + bytes_scr + (8 << 20)
    vmem_bytes = int(min(64 << 20, max(16 << 20, est)))

    kernel = functools.partial(_bottleneck_kernel, H=H, W=W,
                               pad_lead=pad_lead, pad_trail=pad_trail)

    out_nhwc = pl.pallas_call(
        kernel,
        out_shape=jax.ShapeDtypeStruct((N, H, W, Cp_out), jnp.float32),
        grid_spec=pltpu.PrefetchScalarGridSpec(
            num_scalar_prefetch=0,
            grid=(N,),
            in_specs=[
                pl.BlockSpec((1, H, W, Cp_in), lambda n: (n, 0, 0, 0)),
                pl.BlockSpec((Cp_in, Cp_w), lambda n: (0, 0)),
                pl.BlockSpec((1, Cp_w), lambda n: (0, 0)),
                pl.BlockSpec((1, Cp_w), lambda n: (0, 0)),
                pl.BlockSpec((9, Cp_w, Cp_w), lambda n: (0, 0, 0)),
                pl.BlockSpec((1, Cp_w), lambda n: (0, 0)),
                pl.BlockSpec((1, Cp_w), lambda n: (0, 0)),
                pl.BlockSpec((Cp_w, Cp_out), lambda n: (0, 0)),
                pl.BlockSpec((1, Cp_out), lambda n: (0, 0)),
                pl.BlockSpec((1, Cp_out), lambda n: (0, 0)),
            ],
            out_specs=pl.BlockSpec((1, H, W, Cp_out), lambda n: (n, 0, 0, 0)),
            scratch_shapes=[
                pltpu.VMEM((h1_rows, Cp_w), jnp.bfloat16),
                pltpu.VMEM((M, Cp_w), jnp.float32),
            ]),
        compiler_params=pltpu.CompilerParams(
            dimension_semantics=("parallel",),
            vmem_limit_bytes=vmem_bytes),
    )(x_nhwc, w1m, s1, b1, w2m, s2, b2, w3m, s3, b3)

    out = out_nhwc[..., :Cout]
    return jnp.transpose(out, (0, 3, 1, 2))      # back to NCHW


def reference_forward(x, params):
    """Pure-JAX NCHW f32 reference (same math) for validation."""
    def conv(x, w, pad):
        return jax.lax.conv_general_dilated(
            x, w, window_strides=(1, 1), padding=[(pad, pad), (pad, pad)],
            dimension_numbers=("NCHW", "OIHW", "NCHW"))

    def bn(x, p, eps=1e-5):
        g, b, m, v = p
        s = g / jnp.sqrt(v + eps)
        return x * s[None, :, None, None] + (b - m * s)[None, :, None, None]

    out = jax.nn.relu(bn(conv(x, params["w1"], 0), params["bn1"]))
    out = jax.nn.relu(bn(conv(out, params["w2"], 1), params["bn2"]))
    out = bn(conv(out, params["w3"], 0), params["bn3"])
    return jax.nn.relu(out + x)


def make_params(key, inplanes, planes, base_width=64, groups=1):
    width = int(planes * (base_width / 64.0)) * groups
    out_planes = planes * 4  # expansion
    keys = jax.random.split(key, 6)

    def bn_params(k, c):
        k1, k2, k3, k4 = jax.random.split(k, 4)
        gamma = 1.0 + 0.1 * jax.random.normal(k1, (c,), jnp.float32)
        beta = 0.1 * jax.random.normal(k2, (c,), jnp.float32)
        mean = 0.1 * jax.random.normal(k3, (c,), jnp.float32)
        var = jnp.abs(0.5 + 0.1 * jax.random.normal(k4, (c,), jnp.float32))
        return (gamma, beta, mean, var)

    params = {
        "w1": 0.1 * jax.random.normal(keys[0], (width, inplanes, 1, 1), jnp.float32),
        "w2": 0.1 * jax.random.normal(keys[1], (width, width, 3, 3), jnp.float32),
        "w3": 0.1 * jax.random.normal(keys[2], (out_planes, width, 1, 1), jnp.float32),
        "bn1": bn_params(keys[3], width),
        "bn2": bn_params(keys[4], width),
        "bn3": bn_params(keys[5], out_planes),
    }
    return params


if __name__ == "__main__":
    key = jax.random.PRNGKey(0)
    kx, kp = jax.random.split(key)

    # Bottleneck with inplanes == planes * expansion so the residual add works
    # with downsample=None, stride=1.
    N, inplanes, planes, H, W = 2, 16, 4, 8, 8
    x = jax.random.normal(kx, (N, inplanes, H, W), jnp.float32)
    params = make_params(kp, inplanes, planes)

    out = jax.block_until_ready(bottleneck_forward(x, params))
    ref = jax.block_until_ready(reference_forward(x, params))

    assert out.shape == ref.shape == (N, planes * 4, H, W)
    # bf16 MXU operands with f32 accumulation -> loosen tolerance vs pure f32.
    np.testing.assert_allclose(np.asarray(out), np.asarray(ref),
                               atol=2e-2, rtol=2e-2)

    print("KERNEL_OK")
</pallas_src>

<mosaic_0001>
module attributes {stable_mosaic.version = 11 : i64} {
  func.func @_bottleneck_kernel(%arg0: i32, %arg1: memref<1x8x8x128xf32, #tpu.memory_space<vmem>>, %arg2: memref<128x128xbf16, #tpu.memory_space<vmem>>, %arg3: memref<1x128xf32, #tpu.memory_space<vmem>>, %arg4: memref<1x128xf32, #tpu.memory_space<vmem>>, %arg5: memref<9x128x128xbf16, #tpu.memory_space<vmem>>, %arg6: memref<1x128xf32, #tpu.memory_space<vmem>>, %arg7: memref<1x128xf32, #tpu.memory_space<vmem>>, %arg8: memref<128x128xbf16, #tpu.memory_space<vmem>>, %arg9: memref<1x128xf32, #tpu.memory_space<vmem>>, %arg10: memref<1x128xf32, #tpu.memory_space<vmem>>, %arg11: memref<1x8x8x128xf32, #tpu.memory_space<vmem>>, %arg12: memref<96x128xbf16, #tpu.memory_space<vmem>>, %arg13: memref<64x128xf32, #tpu.memory_space<vmem>>) attributes {dimension_semantics = [#tpu.dimension_semantics<parallel>], iteration_bounds = array<i64: 2>, scalar_prefetch = 0 : i64, scratch_operands = 2 : i64, tpu.core_type = #tpu.core_type<tc>, window_params = [{transform_indices = @transform_0, window_bounds = array<i64: 1, 8, 8, 128>}, {pipeline_mode = #tpu.pipeline_mode<synchronous>, transform_indices = @transform_1, window_bounds = array<i64: 128, 128>}, {pipeline_mode = #tpu.pipeline_mode<synchronous>, transform_indices = @transform_2, window_bounds = array<i64: 1, 128>}, {pipeline_mode = #tpu.pipeline_mode<synchronous>, transform_indices = @transform_3, window_bounds = array<i64: 1, 128>}, {pipeline_mode = #tpu.pipeline_mode<synchronous>, transform_indices = @transform_4, window_bounds = array<i64: 9, 128, 128>}, {pipeline_mode = #tpu.pipeline_mode<synchronous>, transform_indices = @transform_5, window_bounds = array<i64: 1, 128>}, {pipeline_mode = #tpu.pipeline_mode<synchronous>, transform_indices = @transform_6, window_bounds = array<i64: 1, 128>}, {pipeline_mode = #tpu.pipeline_mode<synchronous>, transform_indices = @transform_7, window_bounds = array<i64: 128, 128>}, {pipeline_mode = #tpu.pipeline_mode<synchronous>, transform_indices = @transform_8, window_bounds = array<i64: 1, 128>}, {pipeline_mode = #tpu.pipeline_mode<synchronous>, transform_indices = @transform_9, window_bounds = array<i64: 1, 128>}, {transform_indices = @transform_10, window_bounds = array<i64: 1, 8, 8, 128>}]} {
    %c0_i32 = arith.constant 0 : i32
    %0 = arith.cmpi eq, %arg0, %c0_i32 : i32
    %1 = arith.extui %0 : i1 to i32
    %c0_i32_0 = arith.constant 0 : i32
    %2 = arith.cmpi ne, %1, %c0_i32_0 : i32
    scf.if %2 {
      %cst_121 = arith.constant 0.000000e+00 : bf16
      %151 = vector.broadcast %cst_121 : bf16 to vector<16x128xbf16>
      %c0_122 = arith.constant 0 : index
      %c0_123 = arith.constant 0 : index
      %152 = vector.load %arg12[%c0_122, %c0_123] : memref<96x128xbf16, #tpu.memory_space<vmem>>, vector<16x128xbf16>
      tpu.vector_store %arg12[%c0_122, %c0_123], %151 {strides = array<i32>} : memref<96x128xbf16, #tpu.memory_space<vmem>>, vector<16x128xbf16>,
      %cst_124 = arith.constant 0.000000e+00 : bf16
      %153 = vector.broadcast %cst_124 : bf16 to vector<16x128xbf16>
      %c80 = arith.constant 80 : index
      %c0_125 = arith.constant 0 : index
      %154 = vector.load %arg12[%c80, %c0_125] : memref<96x128xbf16, #tpu.memory_space<vmem>>, vector<16x128xbf16>
      tpu.vector_store %arg12[%c80, %c0_125], %153 {strides = array<i32>} : memref<96x128xbf16, #tpu.memory_space<vmem>>, vector<16x128xbf16>,
    } else {
    }
    %c0 = arith.constant 0 : index
    %c0_1 = arith.constant 0 : index
    %c0_2 = arith.constant 0 : index
    %c0_3 = arith.constant 0 : index
    %3 = vector.load %arg1[%c0, %c0_1, %c0_2, %c0_3] : memref<1x8x8x128xf32, #tpu.memory_space<vmem>>, vector<1x8x8x128xf32>
    %4 = vector.shape_cast %3 : vector<1x8x8x128xf32> to vector<64x128xf32>
    %5 = arith.truncf %4 : vector<64x128xf32> to vector<64x128xbf16>
    %c0_4 = arith.constant 0 : index
    %c0_5 = arith.constant 0 : index
    %6 = vector.load %arg2[%c0_4, %c0_5] : memref<128x128xbf16, #tpu.memory_space<vmem>>, vector<128x128xbf16>
    %cst = arith.constant dense<0.000000e+00> : vector<64x128xf32>
    %7 = tpu.matmul %5, %6, %cst {dimension_numbers = #tpu.dot_dimension_numbers<[1], [0], [0], [1], [0, 0, 1, 1], [], []>} : vector<64x128xbf16>, vector<128x128xbf16>, vector<64x128xf32> -> vector<64x128xf32>
    %c0_6 = arith.constant 0 : index
    %c0_7 = arith.constant 0 : index
    %8 = vector.load %arg3[%c0_6, %c0_7] : memref<1x128xf32, #tpu.memory_space<vmem>>, vector<1x128xf32>
    %9 = vector.broadcast %8 : vector<1x128xf32> to vector<64x128xf32>
    %10 = arith.mulf %7, %9 : vector<64x128xf32>
    %c0_8 = arith.constant 0 : index
    %c0_9 = arith.constant 0 : index
    %11 = vector.load %arg4[%c0_8, %c0_9] : memref<1x128xf32, #tpu.memory_space<vmem>>, vector<1x128xf32>
    %12 = vector.broadcast %11 : vector<1x128xf32> to vector<64x128xf32>
    %13 = arith.addf %10, %12 : vector<64x128xf32>
    %cst_10 = arith.constant 0.000000e+00 : f32
    %14 = vector.broadcast %cst_10 : f32 to vector<64x128xf32>
    %15 = arith.maximumf %13, %14 : vector<64x128xf32>
    %16 = arith.truncf %15 : vector<64x128xf32> to vector<64x128xbf16>
    %c16 = arith.constant 16 : index
    %c0_11 = arith.constant 0 : index
    %17 = vector.load %arg12[%c16, %c0_11] : memref<96x128xbf16, #tpu.memory_space<vmem>>, vector<64x128xbf16>
    tpu.vector_store %arg12[%c16, %c0_11], %16 {strides = array<i32>} : memref<96x128xbf16, #tpu.memory_space<vmem>>, vector<64x128xbf16>,
    %cst_12 = arith.constant 0.000000e+00 : f32
    %18 = vector.broadcast %cst_12 : f32 to vector<64x128xf32>
    %c0_13 = arith.constant 0 : index
    %c0_14 = arith.constant 0 : index
    %19 = vector.load %arg13[%c0_13, %c0_14] : memref<64x128xf32, #tpu.memory_space<vmem>>, vector<64x128xf32>
    tpu.vector_store %arg13[%c0_13, %c0_14], %18 {strides = array<i32>} : memref<64x128xf32, #tpu.memory_space<vmem>>, vector<64x128xf32>,
    %20 = tpu.iota {dimensions = array<i32: 0>} : vector<64x1xi32>
    %c8_i32 = arith.constant 8 : i32
    %c0_i32_15 = arith.constant 0 : i32
    %21 = arith.cmpi eq, %c8_i32, %c0_i32_15 : i32
    %c1_i32 = arith.constant 1 : i32
    %22 = arith.select %21, %c1_i32, %c8_i32 : i32
    %23 = vector.broadcast %22 : i32 to vector<64x1xi32>
    %24 = arith.remsi %20, %23 : vector<64x1xi32>
    %c0_i32_16 = arith.constant 0 : i32
    %25 = vector.broadcast %c0_i32_16 : i32 to vector<64x1xi32>
    %26 = arith.cmpi ne, %24, %25 : vector<64x1xi32>
    %c0_i32_17 = arith.constant 0 : i32
    %27 = vector.broadcast %c0_i32_17 : i32 to vector<64x1xi32>
    %28 = arith.cmpi slt, %24, %27 : vector<64x1xi32>
    %c0_i32_18 = arith.constant 0 : i32
    %29 = arith.cmpi slt, %22, %c0_i32_18 : i32
    %30 = vector.broadcast %29 : i1 to vector<64x1xi1>
    %31 = vector.broadcast %30 : vector<64x1xi1> to vector<64x1xi1>
    %32 = arith.xori %28, %31 : vector<64x1xi1>
    %33 = arith.andi %32, %26 : vector<64x1xi1>
    %34 = vector.broadcast %22 : i32 to vector<64x1xi32>
    %35 = arith.addi %24, %34 : vector<64x1xi32>
    %36 = arith.select %33, %35, %24 : vector<64x1xi1>, vector<64x1xi32>
    %c1_i32_19 = arith.constant 1 : i32
    %37 = vector.broadcast %c1_i32_19 : i32 to vector<64x1xi32>
    %38 = arith.cmpi sge, %36, %37 : vector<64x1xi32>
    %c6_i32 = arith.constant 6 : i32
    %39 = vector.broadcast %c6_i32 : i32 to vector<64x1xi32>
    %40 = arith.cmpi sle, %36, %39 : vector<64x1xi32>
    %c7 = arith.constant 7 : index
    %c0_20 = arith.constant 0 : index
    %41 = vector.load %arg12[%c7, %c0_20] : memref<96x128xbf16, #tpu.memory_space<vmem>>, vector<64x128xbf16>
    %cst_21 = arith.constant 0.000000e+00 : bf16
    %42 = vector.broadcast %cst_21 : bf16 to vector<64x128xbf16>
    %43 = vector.shape_cast %38 : vector<64x1xi1> to vector<64x1xi1>
    %44 = vector.broadcast %43 : vector<64x1xi1> to vector<64x128xi1>
    %45 = arith.select %44, %41, %42 : vector<64x128xi1>, vector<64x128xbf16>
    %c0_22 = arith.constant 0 : index
    %c0_23 = arith.constant 0 : index
    %46 = vector.load %arg13[%c0_22, %c0_23] : memref<64x128xf32, #tpu.memory_space<vmem>>, vector<64x128xf32>
    %c0_24 = arith.constant 0 : index
    %c0_25 = arith.constant 0 : index
    %c0_26 = arith.constant 0 : index
    %47 = vector.load %arg5[%c0_24, %c0_25, %c0_26] : memref<9x128x128xbf16, #tpu.memory_space<vmem>>, vector<1x128x128xbf16>
    %48 = vector.shape_cast %47 : vector<1x128x128xbf16> to vector<128x128xbf16>
    %cst_27 = arith.constant dense<0.000000e+00> : vector<64x128xf32>
    %49 = tpu.matmul %45, %48, %cst_27 {dimension_numbers = #tpu.dot_dimension_numbers<[1], [0], [0], [1], [0, 0, 1, 1], [], []>} : vector<64x128xbf16>, vector<128x128xbf16>, vector<64x128xf32> -> vector<64x128xf32>
    %50 = arith.addf %46, %49 : vector<64x128xf32>
    %c0_28 = arith.constant 0 : index
    %c0_29 = arith.constant 0 : index
    %51 = vector.load %arg13[%c0_28, %c0_29] : memref<64x128xf32, #tpu.memory_space<vmem>>, vector<64x128xf32>
    tpu.vector_store %arg13[%c0_28, %c0_29], %50 {strides = array<i32>} : memref<64x128xf32, #tpu.memory_space<vmem>>, vector<64x128xf32>,
    %c8 = arith.constant 8 : index
    %c0_30 = arith.constant 0 : index
    %52 = vector.load %arg12[%c8, %c0_30] : memref<96x128xbf16, #tpu.memory_space<vmem>>, vector<64x128xbf16>
    %c0_31 = arith.constant 0 : index
    %c0_32 = arith.constant 0 : index
    %53 = vector.load %arg13[%c0_31, %c0_32] : memref<64x128xf32, #tpu.memory_space<vmem>>, vector<64x128xf32>
    %c1 = arith.constant 1 : index
    %c0_33 = arith.constant 0 : index
    %c0_34 = arith.constant 0 : index
    %54 = vector.load %arg5[%c1, %c0_33, %c0_34] : memref<9x128x128xbf16, #tpu.memory_space<vmem>>, vector<1x128x128xbf16>
    %55 = vector.shape_cast %54 : vector<1x128x128xbf16> to vector<128x128xbf16>
    %cst_35 = arith.constant dense<0.000000e+00> : vector<64x128xf32>
    %56 = tpu.matmul %52, %55, %cst_35 {dimension_numbers = #tpu.dot_dimension_numbers<[1], [0], [0], [1], [0, 0, 1, 1], [], []>} : vector<64x128xbf16>, vector<128x128xbf16>, vector<64x128xf32> -> vector<64x128xf32>
    %57 = arith.addf %53, %56 : vector<64x128xf32>
    %c0_36 = arith.constant 0 : index
    %c0_37 = arith.constant 0 : index
    %58 = vector.load %arg13[%c0_36, %c0_37] : memref<64x128xf32, #tpu.memory_space<vmem>>, vector<64x128xf32>
    tpu.vector_store %arg13[%c0_36, %c0_37], %57 {strides = array<i32>} : memref<64x128xf32, #tpu.memory_space<vmem>>, vector<64x128xf32>,
    %c9 = arith.constant 9 : index
    %c0_38 = arith.constant 0 : index
    %59 = vector.load %arg12[%c9, %c0_38] : memref<96x128xbf16, #tpu.memory_space<vmem>>, vector<64x128xbf16>
    %cst_39 = arith.constant 0.000000e+00 : bf16
    %60 = vector.broadcast %cst_39 : bf16 to vector<64x128xbf16>
    %61 = vector.shape_cast %40 : vector<64x1xi1> to vector<64x1xi1>
    %62 = vector.broadcast %61 : vector<64x1xi1> to vector<64x128xi1>
    %63 = arith.select %62, %59, %60 : vector<64x128xi1>, vector<64x128xbf16>
    %c0_40 = arith.constant 0 : index
    %c0_41 = arith.constant 0 : index
    %64 = vector.load %arg13[%c0_40, %c0_41] : memref<64x128xf32, #tpu.memory_space<vmem>>, vector<64x128xf32>
    %c2 = arith.constant 2 : index
    %c0_42 = arith.constant 0 : index
    %c0_43 = arith.constant 0 : index
    %65 = vector.load %arg5[%c2, %c0_42, %c0_43] : memref<9x128x128xbf16, #tpu.memory_space<vmem>>, vector<1x128x128xbf16>
    %66 = vector.shape_cast %65 : vector<1x128x128xbf16> to vector<128x128xbf16>
    %cst_44 = arith.constant dense<0.000000e+00> : vector<64x128xf32>
    %67 = tpu.matmul %63, %66, %cst_44 {dimension_numbers = #tpu.dot_dimension_numbers<[1], [0], [0], [1], [0, 0, 1, 1], [], []>} : vector<64x128xbf16>, vector<128x128xbf16>, vector<64x128xf32> -> vector<64x128xf32>
    %68 = arith.addf %64, %67 : vector<64x128xf32>
    %c0_45 = arith.constant 0 : index
    %c0_46 = arith.constant 0 : index
    %69 = vector.load %arg13[%c0_45, %c0_46] : memref<64x128xf32, #tpu.memory_space<vmem>>, vector<64x128xf32>
    tpu.vector_store %arg13[%c0_45, %c0_46], %68 {strides = array<i32>} : memref<64x128xf32, #tpu.memory_space<vmem>>, vector<64x128xf32>,
    %c15 = arith.constant 15 : index
    %c0_47 = arith.constant 0 : index
    %70 = vector.load %arg12[%c15, %c0_47] : memref<96x128xbf16, #tpu.memory_space<vmem>>, vector<64x128xbf16>
    %cst_48 = arith.constant 0.000000e+00 : bf16
    %71 = vector.broadcast %cst_48 : bf16 to vector<64x128xbf16>
    %72 = vector.shape_cast %38 : vector<64x1xi1> to vector<64x1xi1>
    %73 = vector.broadcast %72 : vector<64x1xi1> to vector<64x128xi1>
    %74 = arith.select %73, %70, %71 : vector<64x128xi1>, vector<64x128xbf16>
    %c0_49 = arith.constant 0 : index
    %c0_50 = arith.constant 0 : index
    %75 = vector.load %arg13[%c0_49, %c0_50] : memref<64x128xf32, #tpu.memory_space<vmem>>, vector<64x128xf32>
    %c3 = arith.constant 3 : index
    %c0_51 = arith.constant 0 : index
    %c0_52 = arith.constant 0 : index
    %76 = vector.load %arg5[%c3, %c0_51, %c0_52] : memref<9x128x128xbf16, #tpu.memory_space<vmem>>, vector<1x128x128xbf16>
    %77 = vector.shape_cast %76 : vector<1x128x128xbf16> to vector<128x128xbf16>
    %cst_53 = arith.constant dense<0.000000e+00> : vector<64x128xf32>
    %78 = tpu.matmul %74, %77, %cst_53 {dimension_numbers = #tpu.dot_dimension_numbers<[1], [0], [0], [1], [0, 0, 1, 1], [], []>} : vector<64x128xbf16>, vector<128x128xbf16>, vector<64x128xf32> -> vector<64x128xf32>
    %79 = arith.addf %75, %78 : vector<64x128xf32>
    %c0_54 = arith.constant 0 : index
    %c0_55 = arith.constant 0 : index
    %80 = vector.load %arg13[%c0_54, %c0_55] : memref<64x128xf32, #tpu.memory_space<vmem>>, vector<64x128xf32>
    tpu.vector_store %arg13[%c0_54, %c0_55], %79 {strides = array<i32>} : memref<64x128xf32, #tpu.memory_space<vmem>>, vector<64x128xf32>,
    %c16_56 = arith.constant 16 : index
    %c0_57 = arith.constant 0 : index
    %81 = vector.load %arg12[%c16_56, %c0_57] : memref<96x128xbf16, #tpu.memory_space<vmem>>, vector<64x128xbf16>
    %c0_58 = arith.constant 0 : index
    %c0_59 = arith.constant 0 : index
    %82 = vector.load %arg13[%c0_58, %c0_59] : memref<64x128xf32, #tpu.memory_space<vmem>>, vector<64x128xf32>
    %c4 = arith.constant 4 : index
    %c0_60 = arith.constant 0 : index
    %c0_61 = arith.constant 0 : index
    %83 = vector.load %arg5[%c4, %c0_60, %c0_61] : memref<9x128x128xbf16, #tpu.memory_space<vmem>>, vector<1x128x128xbf16>
    %84 = vector.shape_cast %83 : vector<1x128x128xbf16> to vector<128x128xbf16>
    %cst_62 = arith.constant dense<0.000000e+00> : vector<64x128xf32>
    %85 = tpu.matmul %81, %84, %cst_62 {dimension_numbers = #tpu.dot_dimension_numbers<[1], [0], [0], [1], [0, 0, 1, 1], [], []>} : vector<64x128xbf16>, vector<128x128xbf16>, vector<64x128xf32> -> vector<64x128xf32>
    %86 = arith.addf %82, %85 : vector<64x128xf32>
    %c0_63 = arith.constant 0 : index
    %c0_64 = arith.constant 0 : index
    %87 = vector.load %arg13[%c0_63, %c0_64] : memref<64x128xf32, #tpu.memory_space<vmem>>, vector<64x128xf32>
    tpu.vector_store %arg13[%c0_63, %c0_64], %86 {strides = array<i32>} : memref<64x128xf32, #tpu.memory_space<vmem>>, vector<64x128xf32>,
    %c17 = arith.constant 17 : index
    %c0_65 = arith.constant 0 : index
    %88 = vector.load %arg12[%c17, %c0_65] : memref<96x128xbf16, #tpu.memory_space<vmem>>, vector<64x128xbf16>
    %cst_66 = arith.constant 0.000000e+00 : bf16
    %89 = vector.broadcast %cst_66 : bf16 to vector<64x128xbf16>
    %90 = vector.shape_cast %40 : vector<64x1xi1> to vector<64x1xi1>
    %91 = vector.broadcast %90 : vector<64x1xi1> to vector<64x128xi1>
    %92 = arith.select %91, %88, %89 : vector<64x128xi1>, vector<64x128xbf16>
    %c0_67 = arith.constant 0 : index
    %c0_68 = arith.constant 0 : index
    %93 = vector.load %arg13[%c0_67, %c0_68] : memref<64x128xf32, #tpu.memory_space<vmem>>, vector<64x128xf32>
    %c5 = arith.constant 5 : index
    %c0_69 = arith.constant 0 : index
    %c0_70 = arith.constant 0 : index
    %94 = vector.load %arg5[%c5, %c0_69, %c0_70] : memref<9x128x128xbf16, #tpu.memory_space<vmem>>, vector<1x128x128xbf16>
    %95 = vector.shape_cast %94 : vector<1x128x128xbf16> to vector<128x128xbf16>
    %cst_71 = arith.constant dense<0.000000e+00> : vector<64x128xf32>
    %96 = tpu.matmul %92, %95, %cst_71 {dimension_numbers = #tpu.dot_dimension_numbers<[1], [0], [0], [1], [0, 0, 1, 1], [], []>} : vector<64x128xbf16>, vector<128x128xbf16>, vector<64x128xf32> -> vector<64x128xf32>
    %97 = arith.addf %93, %96 : vector<64x128xf32>
    %c0_72 = arith.constant 0 : index
    %c0_73 = arith.constant 0 : index
    %98 = vector.load %arg13[%c0_72, %c0_73] : memref<64x128xf32, #tpu.memory_space<vmem>>, vector<64x128xf32>
    tpu.vector_store %arg13[%c0_72, %c0_73], %97 {strides = array<i32>} : memref<64x128xf32, #tpu.memory_space<vmem>>, vector<64x128xf32>,
    %c23 = arith.constant 23 : index
    %c0_74 = arith.constant 0 : index
    %99 = vector.load %arg12[%c23, %c0_74] : memref<96x128xbf16, #tpu.memory_space<vmem>>, vector<64x128xbf16>
    %cst_75 = arith.constant 0.000000e+00 : bf16
    %100 = vector.broadcast %cst_75 : bf16 to vector<64x128xbf16>
    %101 = vector.shape_cast %38 : vector<64x1xi1> to vector<64x1xi1>
    %102 = vector.broadcast %101 : vector<64x1xi1> to vector<64x128xi1>
    %103 = arith.select %102, %99, %100 : vector<64x128xi1>, vector<64x128xbf16>
    %c0_76 = arith.constant 0 : index
    %c0_77 = arith.constant 0 : index
    %104 = vector.load %arg13[%c0_76, %c0_77] : memref<64x128xf32, #tpu.memory_space<vmem>>, vector<64x128xf32>
    %c6 = arith.constant 6 : index
    %c0_78 = arith.constant 0 : index
    %c0_79 = arith.constant 0 : index
    %105 = vector.load %arg5[%c6, %c0_78, %c0_79] : memref<9x128x128xbf16, #tpu.memory_space<vmem>>, vector<1x128x128xbf16>
    %106 = vector.shape_cast %105 : vector<1x128x128xbf16> to vector<128x128xbf16>
    %cst_80 = arith.constant dense<0.000000e+00> : vector<64x128xf32>
    %107 = tpu.matmul %103, %106, %cst_80 {dimension_numbers = #tpu.dot_dimension_numbers<[1], [0], [0], [1], [0, 0, 1, 1], [], []>} : vector<64x128xbf16>, vector<128x128xbf16>, vector<64x128xf32> -> vector<64x128xf32>
    %108 = arith.addf %104, %107 : vector<64x128xf32>
    %c0_81 = arith.constant 0 : index
    %c0_82 = arith.constant 0 : index
    %109 = vector.load %arg13[%c0_81, %c0_82] : memref<64x128xf32, #tpu.memory_space<vmem>>, vector<64x128xf32>
    tpu.vector_store %arg13[%c0_81, %c0_82], %108 {strides = array<i32>} : memref<64x128xf32, #tpu.memory_space<vmem>>, vector<64x128xf32>,
    %c24 = arith.constant 24 : index
    %c0_83 = arith.constant 0 : index
    %110 = vector.load %arg12[%c24, %c0_83] : memref<96x128xbf16, #tpu.memory_space<vmem>>, vector<64x128xbf16>
    %c0_84 = arith.constant 0 : index
    %c0_85 = arith.constant 0 : index
    %111 = vector.load %arg13[%c0_84, %c0_85] : memref<64x128xf32, #tpu.memory_space<vmem>>, vector<64x128xf32>
    %c7_86 = arith.constant 7 : index
    %c0_87 = arith.constant 0 : index
    %c0_88 = arith.constant 0 : index
    %112 = vector.load %arg5[%c7_86, %c0_87, %c0_88] : memref<9x128x128xbf16, #tpu.memory_space<vmem>>, vector<1x128x128xbf16>
    %113 = vector.shape_cast %112 : vector<1x128x128xbf16> to vector<128x128xbf16>
    %cst_89 = arith.constant dense<0.000000e+00> : vector<64x128xf32>
    %114 = tpu.matmul %110, %113, %cst_89 {dimension_numbers = #tpu.dot_dimension_numbers<[1], [0], [0], [1], [0, 0, 1, 1], [], []>} : vector<64x128xbf16>, vector<128x128xbf16>, vector<64x128xf32> -> vector<64x128xf32>
    %115 = arith.addf %111, %114 : vector<64x128xf32>
    %c0_90 = arith.constant 0 : index
    %c0_91 = arith.constant 0 : index
    %116 = vector.load %arg13[%c0_90, %c0_91] : memref<64x128xf32, #tpu.memory_space<vmem>>, vector<64x128xf32>
    tpu.vector_store %arg13[%c0_90, %c0_91], %115 {strides = array<i32>} : memref<64x128xf32, #tpu.memory_space<vmem>>, vector<64x128xf32>,
    %c25 = arith.constant 25 : index
    %c0_92 = arith.constant 0 : index
    %117 = vector.load %arg12[%c25, %c0_92] : memref<96x128xbf16, #tpu.memory_space<vmem>>, vector<64x128xbf16>
    %cst_93 = arith.constant 0.000000e+00 : bf16
    %118 = vector.broadcast %cst_93 : bf16 to vector<64x128xbf16>
    %119 = vector.shape_cast %40 : vector<64x1xi1> to vector<64x1xi1>
    %120 = vector.broadcast %119 : vector<64x1xi1> to vector<64x128xi1>
    %121 = arith.select %120, %117, %118 : vector<64x128xi1>, vector<64x128xbf16>
    %c0_94 = arith.constant 0 : index
    %c0_95 = arith.constant 0 : index
    %122 = vector.load %arg13[%c0_94, %c0_95] : memref<64x128xf32, #tpu.memory_space<vmem>>, vector<64x128xf32>
    %c8_96 = arith.constant 8 : index
    %c0_97 = arith.constant 0 : index
    %c0_98 = arith.constant 0 : index
    %123 = vector.load %arg5[%c8_96, %c0_97, %c0_98] : memref<9x128x128xbf16, #tpu.memory_space<vmem>>, vector<1x128x128xbf16>
    %124 = vector.shape_cast %123 : vector<1x128x128xbf16> to vector<128x128xbf16>
    %cst_99 = arith.constant dense<0.000000e+00> : vector<64x128xf32>
    %125 = tpu.matmul %121, %124, %cst_99 {dimension_numbers = #tpu.dot_dimension_numbers<[1], [0], [0], [1], [0, 0, 1, 1], [], []>} : vector<64x128xbf16>, vector<128x128xbf16>, vector<64x128xf32> -> vector<64x128xf32>
    %126 = arith.addf %122, %125 : vector<64x128xf32>
    %c0_100 = arith.constant 0 : index
    %c0_101 = arith.constant 0 : index
    %127 = vector.load %arg13[%c0_100, %c0_101] : memref<64x128xf32, #tpu.memory_space<vmem>>, vector<64x128xf32>
    tpu.vector_store %arg13[%c0_100, %c0_101], %126 {strides = array<i32>} : memref<64x128xf32, #tpu.memory_space<vmem>>, vector<64x128xf32>,
    %c0_102 = arith.constant 0 : index
    %c0_103 = arith.constant 0 : index
    %128 = vector.load %arg13[%c0_102, %c0_103] : memref<64x128xf32, #tpu.memory_space<vmem>>, vector<64x128xf32>
    %c0_104 = arith.constant 0 : index
    %c0_105 = arith.constant 0 : index
    %129 = vector.load %arg6[%c0_104, %c0_105] : memref<1x128xf32, #tpu.memory_space<vmem>>, vector<1x128xf32>
    %130 = vector.broadcast %129 : vector<1x128xf32> to vector<64x128xf32>
    %131 = arith.mulf %128, %130 : vector<64x128xf32>
    %c0_106 = arith.constant 0 : index
    %c0_107 = arith.constant 0 : index
    %132 = vector.load %arg7[%c0_106, %c0_107] : memref<1x128xf32, #tpu.memory_space<vmem>>, vector<1x128xf32>
    %133 = vector.broadcast %132 : vector<1x128xf32> to vector<64x128xf32>
    %134 = arith.addf %131, %133 : vector<64x128xf32>
    %cst_108 = arith.constant 0.000000e+00 : f32
    %135 = vector.broadcast %cst_108 : f32 to vector<64x128xf32>
    %136 = arith.maximumf %134, %135 : vector<64x128xf32>
    %137 = arith.truncf %136 : vector<64x128xf32> to vector<64x128xbf16>
    %c0_109 = arith.constant 0 : index
    %c0_110 = arith.constant 0 : index
    %138 = vector.load %arg8[%c0_109, %c0_110] : memref<128x128xbf16, #tpu.memory_space<vmem>>, vector<128x128xbf16>
    %cst_111 = arith.constant dense<0.000000e+00> : vector<64x128xf32>
    %139 = tpu.matmul %137, %138, %cst_111 {dimension_numbers = #tpu.dot_dimension_numbers<[1], [0], [0], [1], [0, 0, 1, 1], [], []>} : vector<64x128xbf16>, vector<128x128xbf16>, vector<64x128xf32> -> vector<64x128xf32>
    %c0_112 = arith.constant 0 : index
    %c0_113 = arith.constant 0 : index
    %140 = vector.load %arg9[%c0_112, %c0_113] : memref<1x128xf32, #tpu.memory_space<vmem>>, vector<1x128xf32>
    %141 = vector.broadcast %140 : vector<1x128xf32> to vector<64x128xf32>
    %142 = arith.mulf %139, %141 : vector<64x128xf32>
    %c0_114 = arith.constant 0 : index
    %c0_115 = arith.constant 0 : index
    %143 = vector.load %arg10[%c0_114, %c0_115] : memref<1x128xf32, #tpu.memory_space<vmem>>, vector<1x128xf32>
    %144 = vector.broadcast %143 : vector<1x128xf32> to vector<64x128xf32>
    %145 = arith.addf %142, %144 : vector<64x128xf32>
    %146 = arith.addf %145, %4 : vector<64x128xf32>
    %cst_116 = arith.constant 0.000000e+00 : f32
    %147 = vector.broadcast %cst_116 : f32 to vector<64x128xf32>
    %148 = arith.maximumf %146, %147 : vector<64x128xf32>
    %149 = vector.shape_cast %148 : vector<64x128xf32> to vector<1x8x8x128xf32>
    %c0_117 = arith.constant 0 : index
    %c0_118 = arith.constant 0 : index
    %c0_119 = arith.constant 0 : index
    %c0_120 = arith.constant 0 : index
    %150 = vector.load %arg11[%c0_117, %c0_118, %c0_119, %c0_120] : memref<1x8x8x128xf32, #tpu.memory_space<vmem>>, vector<1x8x8x128xf32>
    tpu.vector_store %arg11[%c0_117, %c0_118, %c0_119, %c0_120], %149 {strides = array<i32>} : memref<1x8x8x128xf32, #tpu.memory_space<vmem>>, vector<1x8x8x128xf32>,
    return
  }
  func.func @transform_0(%arg0: i32) -> (i32, i32, i32, i32) {
    %c0_i32 = arith.constant 0 : i32
    %c0_i32_0 = arith.constant 0 : i32
    %c0_i32_1 = arith.constant 0 : i32
    %c0_i32_2 = arith.constant 0 : i32
    return %arg0, %c0_i32, %c0_i32_0, %c0_i32_1 : i32, i32, i32, i32
  }
  func.func @transform_1(%arg0: i32) -> (i32, i32) {
    %c0_i32 = arith.constant 0 : i32
    %c0_i32_0 = arith.constant 0 : i32
    %c0_i32_1 = arith.constant 0 : i32
    return %c0_i32, %c0_i32_0 : i32, i32
  }
  func.func @transform_2(%arg0: i32) -> (i32, i32) {
    %c0_i32 = arith.constant 0 : i32
    %c0_i32_0 = arith.constant 0 : i32
    %c0_i32_1 = arith.constant 0 : i32
    return %c0_i32, %c0_i32_0 : i32, i32
  }
  func.func @transform_3(%arg0: i32) -> (i32, i32) {
    %c0_i32 = arith.constant 0 : i32
    %c0_i32_0 = arith.constant 0 : i32
    %c0_i32_1 = arith.constant 0 : i32
    return %c0_i32, %c0_i32_0 : i32, i32
  }
  func.func @transform_4(%arg0: i32) -> (i32, i32, i32) {
    %c0_i32 = arith.constant 0 : i32
    %c0_i32_0 = arith.constant 0 : i32
    %c0_i32_1 = arith.constant 0 : i32
    %c0_i32_2 = arith.constant 0 : i32
    return %c0_i32, %c0_i32_0, %c0_i32_1 : i32, i32, i32
  }
  func.func @transform_5(%arg0: i32) -> (i32, i32) {
    %c0_i32 = arith.constant 0 : i32
    %c0_i32_0 = arith.constant 0 : i32
    %c0_i32_1 = arith.constant 0 : i32
    return %c0_i32, %c0_i32_0 : i32, i32
  }
  func.func @transform_6(%arg0: i32) -> (i32, i32) {
    %c0_i32 = arith.constant 0 : i32
    %c0_i32_0 = arith.constant 0 : i32
    %c0_i32_1 = arith.constant 0 : i32
    return %c0_i32, %c0_i32_0 : i32, i32
  }
  func.func @transform_7(%arg0: i32) -> (i32, i32) {
    %c0_i32 = arith.constant 0 : i32
    %c0_i32_0 = arith.constant 0 : i32
    %c0_i32_1 = arith.constant 0 : i32
    return %c0_i32, %c0_i32_0 : i32, i32
  }
  func.func @transform_8(%arg0: i32) -> (i32, i32) {
    %c0_i32 = arith.constant 0 : i32
    %c0_i32_0 = arith.constant 0 : i32
    %c0_i32_1 = arith.constant 0 : i32
    return %c0_i32, %c0_i32_0 : i32, i32
  }
  func.func @transform_9(%arg0: i32) -> (i32, i32) {
    %c0_i32 = arith.constant 0 : i32
    %c0_i32_0 = arith.constant 0 : i32
    %c0_i32_1 = arith.constant 0 : i32
    return %c0_i32, %c0_i32_0 : i32, i32
  }
  func.func @transform_10(%arg0: i32) -> (i32, i32, i32, i32) {
    %c0_i32 = arith.constant 0 : i32
    %c0_i32_0 = arith.constant 0 : i32
    %c0_i32_1 = arith.constant 0 : i32
    %c0_i32_2 = arith.constant 0 : i32
    return %arg0, %c0_i32, %c0_i32_0, %c0_i32_1 : i32, i32, i32, i32
  }
}

</mosaic_0001>

<bundles_post_ra>
// kernel: tpu_custom_call.1
= control target key start
LH: loop header
LB: loop body
LE: loop exit
PB: predicated region body
PF: predicated region fallthrough
CT: control target
= control target key end

     0   :  { %s4951_s0 = inlined_call_operand.hbm [shape: f32[2,8,8,128], index: 0, kind: input, shape index: {}]   ;;  %s4952_s1 = inlined_call_operand.hbm [shape: bf16[128,128], index: 1, kind: input, shape index: {}]   ;;  %s4953_s2 = inlined_call_operand.vmem [shape: f32[1,128], index: 2, kind: input, shape index: {}]   ;;  %s4954_s3 = inlined_call_operand.vmem [shape: f32[1,128], index: 3, kind: input, shape index: {}]   ;;  %s4955_s4 = inlined_call_operand.hbm [shape: bf16[9,128,128], index: 4, kind: input, shape index: {}]   ;;  %s4956_s5 = inlined_call_operand.vmem [shape: f32[1,128], index: 5, kind: input, shape index: {}]   ;;  %s4957_s6 = inlined_call_operand.vmem [shape: f32[1,128], index: 6, kind: input, shape index: {}]   ;;  %s4958_s7 = inlined_call_operand.hbm [shape: bf16[128,128], index: 7, kind: input, shape index: {}]   ;;  %s4959_s8 = inlined_call_operand.vmem [shape: f32[1,128], index: 8, kind: input, shape index: {}]   ;;  %s4960_s9 = inlined_call_operand.vmem [shape: f32[1,128], index: 9, kind: input, shape index: {}]   ;;  %s4961_s10 = inlined_call_operand.hbm [shape: f32[2,8,8,128], index: 10, kind: output, shape index: {}]  }
   0x1   :  { %4969 = sst [smem:[#allocation18_spill]] %s4952_s1 }
   0x2   :  { %4970 = sst [smem:[#allocation19_spill]] %s4955_s4 }
   0x3   :  { %4971 = sst [smem:[#allocation20_spill]] %s4958_s7 }
   0x4   :  { %15 = vsyncpa [#allocation5], 0 }
   0x5   :  { %17 = vsyncpa [#allocation5 + $0x1], 0 }
   0x6   :  { %18 = vsyncpa [#allocation8], 0 }
   0x7   :  { %19 = vsyncpa [#allocation11], 0 }
   0x8   :  { %20 = vsyncpa [#allocation6], 0 }
   0x9   :  { %22 = vsyncpa [#allocation6 + $0x1], 0  ;;  %s3973_s13 = smov 0   ;;  %s3975_s14 = smov 0  }
   0xa   :  { %s3977_s15 = smov 0   ;;  %s3979_s16 = smov 0  }
   0xb LB: > { %s3994_s17 = sadd.s32 4294967295, %s3905_s16   ;;  %s3041_s18 = sadd.s32 4294967294, %s3905_s16   ;;  %s3905_s16 = sphi %s3979_s16, %s5118_s16   ;;  %s3901_s15 = sphi %s3977_s15, %s5117_s15   ;;  %s3897_s14 = sphi %s3975_s14, %s5116_s14   ;;  %s3893_s13 = sphi %s3973_s13, %s5115_s13  }
   0xc   : > { %p48_p0 = scmp.ne.s32.totalorder %s3897_s14, %s3893_s13  ;;  %p49_p1 = scmp.eq.s32.totalorder %s3994_s17, 0 }
   0xd   : > { %p261_p2 = scmp.eq.s32.totalorder %s3994_s17, 1  ;;  %p267_p3 = scmp.eq.s32.totalorder %s3041_s18, 1 }
   0xe   : > { %p4003_p4 = por %p49_p1, %p48_p0  ;;  %p3042_p5 = scmp.ge.s32.totalorder %s3905_s16, 1 }
   0xf   : > { %p4008_p6 = por %p267_p3, %p48_p0  ;;  %p274_p7 = scmp.lt.s32.totalorder %s3905_s16, 3 }
  0x10   : > { %s4974_s1 = sld [smem:[#allocation18_spill]]  ;;  %s3907_s25 = smov [#allocation7]  }
  0x11   : > { %p4017_p9 = pnand %p3042_p5, %p274_p7  ;;  %s287_s26 = sshll.u32 %s3907_s25, 4  ;;  %s288_s26 = int_to_ptr.vmem [resolvable:$true] %s287_s26 }
  0x12   : > { %s4977_s4 = sld [smem:[#allocation19_spill]]  ;;  %s3908_s11 = smov 64  }
  0x13   : > { %p3628_p10 = pneg %p4017_p9  ;;  %s3909_s12 = smov 4  }
  0x14   : > { %s3910_s18 = smov [#allocation9]   ;;  %s4978_s7 = sld [smem:[#allocation20_spill]] }
  0x15   : > { %p4025_p11 = pnand %p3628_p10, %p49_p1  ;;  %s307_s21 = sshll.u32 %s3910_s18, 4  ;;  %s308_s21 = int_to_ptr.vmem [resolvable:$true] %s307_s21 }
  0x16   : > { %s285_s23 = sshll.u32 %s4974_s1, 4  ;;  %s3911_s29 = smov [#allocation10]   ;;  %s286_s23 = int_to_ptr.hbm [resolvable:$true] %s285_s23 }
  0x17   : > { %3631 = dma.hbm_to_vmem [thread:$0]  (!%p4025_p11), %s286_s23, 1024, %s288_s26, [#allocation8], %s3908_s11, %s3908_s11, %s3909_s12  }
  0x18   : > { %s305_s30 = sshll.u32 %s4977_s4, 4  ;;  %s327_s1 = sshll.u32 %s3911_s29, 4  ;;  %s306_s30 = int_to_ptr.hbm [resolvable:$true] %s305_s30  ;;  %s328_s1 = int_to_ptr.vmem [resolvable:$true] %s327_s1 }
  0x19   : > { %3634 = dma.hbm_to_vmem [thread:$0]  (!%p4025_p11), %s306_s30, 9216, %s308_s21, [#allocation8], %s3908_s11, %s3908_s11, %s3909_s12  }
  0x1a   : > { %s325_s28 = sshll.u32 %s4978_s7, 4  ;;  %s4041_s23 = sadd.s32 1, %s3905_s16   ;;  %s326_s28 = int_to_ptr.hbm [resolvable:$true] %s325_s28 }
  0x1b   : > { %3637 = dma.hbm_to_vmem [thread:$0]  (!%p4025_p11), %s326_s28, 1024, %s328_s1, [#allocation11], %s3908_s11, %s3908_s11, %s3909_s12  }
  0x1c   : > { %s32_s26 = ssub.s32 %s3905_s16, %s4041_s23  ;;  %s35_s18 = sadd.s32 1, %s3901_s15 }
  0x1d   : > { %p33_p13 = scmp.eq.s32.totalorder %s32_s26, 0  ;;  %p42_p0 = scmp.ne.s32.totalorder %s3901_s15, %s3897_s14 }
  0x1e   : > { %p43_p3 = scmp.eq.s32.totalorder %s3905_s16, 0  ;;  %p3649_p5 = scmp.lt.s32.totalorder %s3905_s16, 2 }
  0x1f   : > { %s4053_s22 = scalar_select %p33_p13, %s3901_s15, %s35_s18  }
  0x20   : > { %p44_p7 = por %p43_p3, %p42_p0  ;;  %p4057_p10 = por %p261_p2, %p42_p0 }
  0x21   : > { %4979 = sst [smem:[#allocation17_spill]] %s4053_s22  ;;  %s347_s21 = sand.u32 1, %s3901_s15  }
  0x22   : > { %s3462_s25 = sshll.u32 %s3905_s16, 6  ;;  %s3047_s27 = sshll.u32 %s347_s21, 6 }
  0x23   : > { %s356_s11 = scalar_lea.hbm %s4951_s0, %s3462_s25  ;;  %s351_s28 = scalar_lea.vmem [#allocation4], %s3047_s27 }
  0x24   : > { %s357_s12 = sshll.u32 %s356_s11, 4  ;;  %s359_s26 = sshll.u32 %s351_s28, 4  ;;  %s358_s12 = int_to_ptr.hbm [resolvable:$true] %s357_s12  ;;  %s360_s26 = int_to_ptr.vmem [resolvable:$true] %s359_s26 }
  0x25   : > { %p4068_p11 = pnand %p3649_p5, %p44_p7  ;;  %s348_s4 = scalar_lea.sflag [#allocation5], %s347_s21 }
  0x26   : > { %s3801_s7 = sshra.s32 %s358_s12, 4  ;;  %s3808_s29 = scalar_lea.hbm %s4951_s0, 128  ;;  %s3802_s7 = int_to_ptr.hbm [resolvable:$true] %s3801_s7 }
  0x27   : > { %s3803_s22 = scalar_lea.hbm %s3802_s7, 64  ;;  %p3805_p13 = pneg %p4068_p11 }
  0x28   : > { %p3804_p2 = scmp.ne.s32.totalorder %s3802_s7, %s3803_s22  ;;  %p3809_p5 = scmp.lt.s32.totalorder %s3802_s7, %s4951_s0 }
  0x29   : > { %p3810_p7 = scmp.lt.s32.totalorder %s3808_s29, %s3803_s22 }
  0x2a   : > { %p3806_p0 = pnand %p3805_p13, %p3804_p2 }
  0x2b   : > { %p3811_p12 = por %p3810_p7, %p3809_p5 }
  0x2c   : > { %p3807_p3 = pneg %p3806_p0 }
  0x2e   : > { %p3812_p8 = pnand %p3811_p12, %p3807_p3 }
  0x30   : > { %3815 = shalt.err (!%p3812_p8)
}
  0x31   : > { %s3912_s21 = smov 128   ;;  %s3913_s28 = smov 8  }
  0x32   : > { %3641 = dma.hbm_to_vmem [thread:$0]  (!%p4068_p11), %s358_s12, 1024, %s360_s26, %s348_s4, %s3912_s21, %s3912_s21, %s3913_s28  }
  0x33   : > { %371 = sbr.rel (%p4017_p9) target bundleno = 742 (0x2e6), region = 60  ;;  %s4085_s25 = sand.u32 (!%p4017_p9), 1, %s3897_s14  }
  0x34   : > { %s3051_s27 = sshll.u32 (!%p4017_p9), %s4085_s25, 6  ;;  %s374_s7 = scalar_lea.sflag (!%p4017_p9), [#allocation5], %s4085_s25 }
  0x35   : > { %s4089_s22 = scalar_lea.vmem (!%p4017_p9), [#allocation4], %s3051_s27 }
  0x38   : > { %3876 = dma.done.wait (%p4003_p4), %s374_s7, 1024  }
  0x39   : > { %3878 = vsyncadd (%p4003_p4), %s374_s7, 4294966272 }
  0x3a   : > { %3880 = dma.done.wait (%p49_p1), [#allocation8], 10240  }
  0x3b   : > { %3882 = vsyncadd (%p49_p1), [#allocation8], 4294957056 }
  0x3c   : > { %3884 = dma.done.wait (%p49_p1), [#allocation11], 1024  }
  0x3d   : > { %3886 = vsyncadd (%p49_p1), [#allocation11], 4294966272  ;;  %s4103_s4 = scalar_lea.vmem [#allocation12], %s3051_s27  ;;  %p4982_p8 = scmp.ne.s32.totalorder %s3994_s17, 0 }
  0x3f   : > { %436 = sbr.rel (%p4982_p8) target bundleno = 73 (0x49), region = 80 }
  0x44   : > { %v3914_v0 = vmov 0  }
  0x45   : > { %437 = vst [vmem:[#allocation2] sm:$0xf] %v3914_v0 }
  0x46   : > { %438 = vst [vmem:[#allocation2 + $0x4] sm:$0xf] %v3914_v0 }
  0x47   : > { %439 = vst [vmem:[#allocation2 + $0x28] sm:$0xf] %v3914_v0 }
  0x48   : > { %440 = vst [vmem:[#allocation2 + $0x2c] sm:$0xf] %v3914_v0 }
  0x49 PF: > { %v3470_v1 = vld [vmem:[#allocation7 + $0x38] sm:$0xff]  ;;  %v3469_v2 = vld [vmem:[#allocation7 + $0x30] sm:$0xff]  ;;  %v3468_v3 = vld [vmem:[#allocation7 + $0x28] sm:$0xff]  ;;  %v602_v24 = vlaneseq  ;;  %v3915_v38 = vmov 0   ;;  %vm764_vm11 = vsmask.f32 3328 }
  0x4a   : > { %517 = vmatpush.bf16.msra.mxu0 %v3470_v1  ;;  %3588 = vmatpush.bf16.msra.mxu3 %v3470_v1  ;;  %v3467_v4 = vld [vmem:[#allocation7 + $0x20] sm:$0xff]  ;;  %v3466_v5 = vld [vmem:[#allocation7 + $0x18] sm:$0xff]  ;;  %v3465_v7 = vld [vmem:[#allocation7 + $0x10] sm:$0xff]  ;;  %vm765_vm12 = vsmask.f32 7440  ;;  %s3563_s19 = sshll.u32 %s3994_s17, 6 }
  0x4b   : > { %v3490_v6 = vld [vmem:[#allocation9 + $0x78] sm:$0xff]  ;;  %v3464_v8 = vld [vmem:[#allocation7 + $0x8] sm:$0xff]  ;;  %v3463_v9 = vld [vmem:[#allocation7] sm:$0xff]  ;;  %v4115_v25 = vshrl.u32 %v602_v24, 7  ;;  %s2935_s26 = scalar_lea.hbm %s4961_s10, %s3563_s19  ;;  %s2936_s18 = sshll.u32 %s4103_s4, 4  ;;  %s2937_s18 = int_to_ptr.vmem [resolvable:$true] %s2936_s18 }
  0x4c   : > { %1212 = vmatpush.bf16.msra.mxu2 %v3490_v6  ;;  %v441_v10 = vld [vmem:[%s4089_s22] sm:$0xff]  ;;  %v442_v11 = vld [vmem:[%s4089_s22 + $0x8] sm:$0xff]  ;;  %v443_v16 = vld [vmem:[%s4089_s22 + $0x10] sm:$0xff]  ;;  %s2938_s29 = sshll.u32 %s2935_s26, 4  ;;  %s2924_s1 = scalar_lea.sflag [#allocation6], %s4085_s25  ;;  %s2939_s29 = int_to_ptr.hbm [resolvable:$true] %s2938_s29 }
  0x4d   : > { %v445_v12 = vld [vmem:[%s4089_s22 + $0x20] sm:$0xff]  ;;  %v446_v13 = vld [vmem:[%s4089_s22 + $0x28] sm:$0xff]  ;;  %v449_v14 = vpack.c.bf16 %v442_v11, %v441_v10  ;;  %v444_v17 = vld [vmem:[%s4089_s22 + $0x18] sm:$0xff]  ;;  %v604_v28 = vadd.s32 8, %v4115_v25  ;;  %v605_v29 = vadd.s32 16, %v4115_v25  ;;  %v615_v30 = vand.u32 7, %v4115_v25 }
  0x4e   : > { %518 = vmatpush.bf16.msra.mxu0 %v3469_v2  ;;  %3589 = vmatpush.bf16.msra.mxu3 %v3469_v2  ;;  %v451_v15 = vpack.c.bf16 %v446_v13, %v445_v12  ;;  %v447_v18 = vld [vmem:[%s4089_s22 + $0x30] sm:$0xff]  ;;  %v448_v19 = vld [vmem:[%s4089_s22 + $0x38] sm:$0xff]  ;;  %v450_v20 = vpack.c.bf16 %v444_v17, %v443_v16  ;;  %v3488_v23 = vld [vmem:[#allocation9 + $0x68] sm:$0xff]  ;;  %v4121_v35 = vadd.s32 24, %v4115_v25  ;;  %v4177_v13 = vunpack.c.l.b16 %v3915_v38  ;;  %s3845_s17 = sshra.s32 %s2939_s29, 4  ;;  %s3851_s27 = scalar_lea.hbm %s4961_s10, 128  ;;  %s3846_s17 = int_to_ptr.hbm [resolvable:$true] %s3845_s17 }
  0x4f   : > { %v452_v21 = vpack.c.bf16 %v448_v19, %v447_v18  ;;  %v3489_v22 = vld [vmem:[#allocation9 + $0x70] sm:$0xff]  ;;  %v3478_v26 = vld [vmem:[#allocation9 + $0x38] sm:$0xff]  ;;  %v3487_v27 = vld [vmem:[#allocation9 + $0x60] sm:$0xff]  ;;  %v622_v31 = vand.u32 7, %v604_v28  ;;  %v629_v32 = vand.u32 7, %v605_v29  ;;  %vm707_vm0 = vcmp.ge.s32.totalorder %v615_v30, 1  ;;  %p3852_p12 = scmp.lt.s32.totalorder %s3846_s17, %s4961_s10 }
  0x50   : > { %1213 = vmatpush.bf16.msra.mxu2 %v3489_v22  ;;  %1062 = vmatpush.bf16.msra.mxu1 %v3478_v26  ;;  %v3477_v33 = vld [vmem:[#allocation9 + $0x30] sm:$0xff]  ;;  %v3486_v34 = vld [vmem:[#allocation9 + $0x58] sm:$0xff]  ;;  %vm748_vm3 = vmpackc.low %vm707_vm0, %vm707_vm0  ;;  %v636_v37 = vand.u32 7, %v4121_v35  ;;  %vm4129_vm5 = vcmp.le.s32.totalorder %v615_v30, 6  ;;  %v4180_v17 = vunpack.c.h.b16 %v3915_v38  ;;  %s3847_s11 = scalar_lea.hbm %s3846_s17, 64 }
  0x51   : > { %vm708_vm1 = vcmp.ge.s32.totalorder %v622_v31, 1  ;;  %vm4123_vm2 = vcmp.ge.s32.totalorder %v629_v32, 1  ;;  %v756_v39 = vsel %vm748_vm3, 65537, %v3915_v38  ;;  %v3476_v41 = vld [vmem:[#allocation9 + $0x28] sm:$0xff]  ;;  %v3485_v45 = vld [vmem:[#allocation9 + $0x50] sm:$0xff]  ;;  %vm1282_vm8 = vmpackc.low %vm4129_vm5, %vm4129_vm5  ;;  %vm4151_vm10 = vcmp.le.s32.totalorder %v622_v31, 6  ;;  %p3848_p1 = scmp.ne.s32.totalorder %s3846_s17, %s3847_s11  ;;  %p3853_p11 = scmp.lt.s32.totalorder %s3851_s27, %s3847_s11 }
  0x52   : > { %519 = vmatpush.bf16.msra.mxu0 %v3468_v3  ;;  %3590 = vmatpush.bf16.msra.mxu3 %v3468_v3  ;;  %vm749_vm4 = vmpackc.low %vm708_vm1, %vm708_vm1  ;;  %v768_v43 = vshll.u32 %v756_v39, 16  ;;  %v771_v44 = vshrl.u32 %v756_v39, 16  ;;  %vm4139_vm7 = vcmp.ge.s32.totalorder %v636_v37, 1  ;;  %v1290_v54 = vsel %vm1282_vm8, 65537, %v3915_v38  ;;  %v3475_v55 = vld [vmem:[#allocation9 + $0x20] sm:$0xff]  ;;  %v3484_v58 = vld [vmem:[#allocation9 + $0x48] sm:$0xff] }
  0x53   : > { %vm750_vm6 = vmpackc.low %vm4123_vm2, %vm4123_vm2  ;;  %v757_v42 = vsel %vm749_vm4, 65537, %v3915_v38  ;;  %v1302_v62 = vshrl.u32 %v1290_v54, 16  ;;  %v3498_v63 = vld [vmem:[#allocation9 + $0xb8] sm:$0xff]  ;;  %vm4164_vm14 = vcmp.le.s32.totalorder %v629_v32, 6  ;;  %v3483_v10 = vld [vmem:[#allocation9 + $0x40] sm:$0xff]  ;;  %p3849_p4 = pnand %p3848_p1, %p4057_p10  ;;  %p3854_p2 = por %p3853_p11, %p3852_p12 }
  0x54   : > { %1214 = vmatpush.bf16.msra.mxu2 %v3488_v23  ;;  %1063 = vmatpush.bf16.msra.mxu1 %v3477_v33  ;;  %v758_v47 = vsel %vm750_vm6, 65537, %v3915_v38  ;;  %v777_v48 = vshll.u32 %v757_v42, 16  ;;  %v781_v49 = vshrl.u32 %v757_v42, 16  ;;  %vm751_vm9 = vmpackc.low %vm4139_vm7, %vm4139_vm7  ;;  %v770_v50 = vrot.slane %v768_v43, 5  ;;  %v3474_v6 = vld [vmem:[#allocation9 + $0x18] sm:$0xff]  ;;  %v3505_v22 = vld [vmem:[#allocation9 + $0xf0] sm:$0xff] }
  0x55   : > { %v773_v51 = vrot.slane %v771_v44, 4  ;;  %v787_v52 = vshll.u32 %v758_v47, 16  ;;  %v791_v53 = vshrl.u32 %v758_v47, 16  ;;  %v4156_v59 = vsel %vm751_vm9, 65537, %v3915_v38  ;;  %vm4158_vm13 = vmor %vm764_vm11, %vm765_vm12  ;;  %v3473_v23 = vld [vmem:[#allocation9 + $0x10] sm:$0xff]  ;;  %v3496_v30 = vld [vmem:[#allocation9 + $0xa8] sm:$0xff]  ;;  %p3850_p9 = pneg %p3849_p4 }
  0x56   : > { %520 = vmatpush.bf16.msra.mxu0 %v3467_v4  ;;  %3591 = vmatpush.bf16.msra.mxu3 %v3467_v4  ;;  %v779_v60 = vrot.slane %v777_v48, 5  ;;  %v783_v61 = vrot.slane %v781_v49, 4  ;;  %vm1283_vm15 = vmpackc.low %vm4151_vm10, %vm4151_vm10  ;;  %v846_v11 = vunpack.c.l.b16 %v770_v50  ;;  %v847_v12 = vunpack.c.h.b16 %v770_v50  ;;  %v723_v24 = vld [vmem:[#allocation2] sm:$0x8]  ;;  %v724_v26 = vld [vmem:[#allocation2 + $0x4] sm:$0xf] }
  0x57   : > { %v774_v56 = vor.u32 %v773_v51, %v770_v50  ;;  %v4162_v2 = vrot.slane %v787_v52, 5  ;;  %v793_v3 = vrot.slane %v791_v53, 4  ;;  %vm1284_vm0 = vmpackc.low %vm4164_vm14, %vm4164_vm14  ;;  %v4997_v33 = vmov 0  ;;  %v3504_v43 = vld [vmem:[#allocation9 + $0xe8] sm:$0xff]  ;;  %v4221_v49 = vld [vmem:[%s4953_s2] ss:$0 sm:$0xff]  ;;  %p3855_p13 = pnand %p3854_p2, %p3850_p9 }
  0x58   : > { %1215 = vmatpush.bf16.msra.mxu2 %v3487_v27  ;;  %1064 = vmatpush.bf16.msra.mxu1 %v3476_v41  ;;  %v784_v16 = vor.u32 %v783_v61, %v779_v60  ;;  %vm850_vm1 = vcmp.ne.s32.totalorder %v846_v11, %v4177_v13  ;;  %vm851_vm2 = vcmp.ne.s32.totalorder %v847_v12, %v4180_v17  ;;  %v4995_v27 = vmov 0  ;;  %v3472_v44 = vld [vmem:[#allocation9 + $0x8] sm:$0xff]  ;;  %v3495_v50 = vld [vmem:[#allocation9 + $0xa0] sm:$0xff] }
  0x59   : > { %v775_v0 = vrot.slane %v774_v56, 4  ;;  %vm4196_vm5 = vmpackc.low %vm851_vm2, %vm850_vm1  ;;  %v1292_v28 = vsel %vm1284_vm0, 65537, %v3915_v38  ;;  %vm4214_vm7 = vcmp.le.s32.totalorder %v636_v37, 6  ;;  %vm1298_vm9 = vsmask.f32 256  ;;  %v3503_v61 = vld [vmem:[#allocation9 + $0xe0] sm:$0xff] }
  0x5a   : > { %521 = vmatpush.bf16.msra.mxu0 %v3466_v5  ;;  %3592 = vmatpush.bf16.msra.mxu3 %v3466_v5  ;;  %v3506_v5 = vld [vmem:[#allocation9 + $0xf8] sm:$0xff]  ;;  %v4996_v27 = vsel %vm4196_vm5, 4294967295, %v4995_v27  ;;  %v785_v31 = vrot.slane %v784_v16, 4  ;;  %v1319_v48 = vshrl.u32 %v1292_v28, 16  ;;  %vm1285_vm8 = vmpackc.low %vm4214_vm7, %vm4214_vm7  ;;  %vm1299_vm10 = vsmask.f32 4368 }
  0x5b   : > { %v1293_v53 = vsel %vm1285_vm8, 65537, %v3915_v38  ;;  %vm4251_vm12 = vmor %vm1298_vm9, %vm1299_vm10 }
  0x5c   : > { %1216 = vmatpush.bf16.msra.mxu2 %v3486_v34  ;;  %1065 = vmatpush.bf16.msra.mxu1 %v3475_v55  ;;  %v909_v34 = vsel %vm4196_vm5, %v723_v24, 0  ;;  %v4229_v51 = vsel %vm4158_vm13, %v785_v31, %v4162_v2  ;;  %v1321_v57 = vrot.slane %v1319_v48, 7 }
  0x5d   : > { %v951_v41 = vunpack.c.l.b16 %v909_v34 }
  0x5e   : > { %522 = vmatpush.bf16.msra.mxu0 %v3465_v7  ;;  %3593 = vmatpush.bf16.msra.mxu3 %v3465_v7  ;;  %v780_v7 = vsel %vm4158_vm13, %v775_v0, %v779_v60 }
  0x5f   : > { %v853_v18 = vunpack.c.l.b16 %v780_v7  ;;  %v854_v19 = vunpack.c.h.b16 %v780_v7 }
  0x60   : > { %1217 = vmatpush.bf16.msra.mxu2 %v3485_v45  ;;  %1066 = vmatpush.bf16.msra.mxu1 %v3474_v6 }
  0x61   : > { %vm857_vm3 = vcmp.ne.s32.totalorder %v853_v18, %v4177_v13  ;;  %vm858_vm4 = vcmp.ne.s32.totalorder %v854_v19, %v4180_v17  ;;  %v801_v19 = vshrl.u32 %v4156_v59, 16 }
  0x62   : > { %523 = vmatpush.bf16.msra.mxu0 %v3464_v8  ;;  %3594 = vmatpush.bf16.msra.mxu3 %v3464_v8  ;;  %v797_v8 = vshll.u32 %v4156_v59, 16  ;;  %vm4204_vm6 = vmpackc.low %vm858_vm4, %vm857_vm3  ;;  %v860_v59 = vunpack.c.l.b16 %v4229_v51 }
  0x63   : > { %v4998_v33 = vsel %vm4204_vm6, 4294967295, %v4997_v33  ;;  %v910_v40 = vsel %vm4204_vm6, %v724_v26, 0  ;;  %v5007_v26 = vmov 0 }
  0x64   : > { %1218 = vmatpush.bf16.msra.mxu2 %v3484_v58  ;;  %1067 = vmatpush.bf16.msra.mxu1 %v3473_v23  ;;  %v4202_v32 = vrot.slane %v797_v8, 5  ;;  %v952_v45 = vunpack.c.l.b16 %v910_v40  ;;  %v1328_v58 = vshrl.u32 %v1293_v53, 16  ;;  %v1331_v8 = vshll.u32 %v1293_v53, 16 }
  0x65   : > { %v1326_v23 = vrot.slane %v1321_v57, 4  ;;  %vm4305_vm3 = vcmp.ne.s32.totalorder %v860_v59, %v4177_v13 }
  0x66   : > { %524 = vmatpush.bf16.msra.mxu0 %v3463_v9  ;;  %3595 = vmatpush.bf16.msra.mxu3 %v3463_v9  ;;  %v4174_v9 = vrot.slane %v1302_v62, 7  ;;  %v960_v52 = vpack.c.b16 %v952_v45, %v951_v41  ;;  %v3471_v62 = vld [vmem:[#allocation9] sm:$0xff]  ;;  %v4255_v7 = vrot.slane %v1328_v58, 7 }
  0x68   : > { %1219 = vmatpush.bf16.msra.mxu2 %v3483_v10  ;;  %1068 = vmatpush.bf16.msra.mxu1 %v3472_v44  ;;  %v1308_v56 = vrot.slane %v4174_v9, 4  ;;  %v970_v0 = vshll.u32 %v960_v52, 16  ;;  %v3494_v10 = vld [vmem:[#allocation9 + $0x98] sm:$0xff]  ;;  %v1333_v24 = vor.u32 %v1331_v8, %v4255_v7 }
  0x69   : > { %525 = vmatmul.bf16.vlgmr.msra.gmra.mxu0 %v449_v14  ;;  %535 = vmatmul.bf16.vlgmr.msra.gmra.mxu3 %v451_v15  ;;  %v1305_v14 = vshll.u32 %v1290_v54, 16  ;;  %v3497_v15 = vld [vmem:[#allocation9 + $0xb0] sm:$0xff]  ;;  %v1322_v54 = vshll.u32 %v1292_v28, 16 }
  0x6a   : > { %1581 = vmatpush.bf16.msrb.mxu3 %v3498_v63  ;;  %1788 = vmatpush.bf16.msrb.mxu0 %v3506_v5  ;;  %v967_v63 = vshrl.u32 %v960_v52, 16  ;;  %v4247_v5 = vld [vmem:[%s4954_s3] ss:$0 sm:$0xff]  ;;  %v4266_v18 = vrot.slane %v970_v0, 4  ;;  %v3546_v0 = vld [vmem:[#allocation9 + $0x1f8] sm:$0xff] }
  0x6b   : > { %v1307_v29 = vor.u32 %v1305_v14, %v4174_v9  ;;  %v1324_v12 = vor.u32 %v1322_v54, %v1321_v57  ;;  %v607_v14 = vadd.s32 32, %v4115_v25  ;;  %v3500_v57 = vld [vmem:[#allocation9 + $0xc8] sm:$0xff]  ;;  %v4330_v9 = vld [vmem:[#allocation2 + $0x4] sm:$0x8] }
  0x6c   : > { %1069 = vmatpush.bf16.msra.mxu1 %v3471_v62  ;;  %v4264_v16 = vrot.slane %v967_v63, 3 }
  0x6d   : > { %v1372_v35 = vunpack.c.l.b16 %v1307_v29  ;;  %v1373_v37 = vunpack.c.h.b16 %v1307_v29  ;;  %v861_v29 = vunpack.c.h.b16 %v4229_v51  ;;  %v643_v40 = vand.u32 7, %v607_v14 }
  0x6e   : > { %1582 = vmatpush.bf16.msrb.mxu3 %v3497_v15  ;;  %1789 = vmatpush.bf16.msrb.mxu0 %v3505_v22  ;;  %v608_v15 = vadd.s32 40, %v4115_v25  ;;  %v973_v42 = vor.u32 %v4266_v18, %v4264_v16 }
  0x6f   : > { %vm4239_vm11 = vcmp.ne.s32.totalorder %v1372_v35, %v4177_v13  ;;  %vm4258_vm14 = vcmp.ne.s32.totalorder %v1373_v37, %v4180_v17  ;;  %v4296_v35 = vsel %vm4251_vm12, %v1326_v23, %v1333_v24  ;;  %vm711_vm0 = vcmp.ge.s32.totalorder %v643_v40, 1  ;;  %v3499_v24 = vld [vmem:[#allocation9 + $0xc0] sm:$0xff] }
  0x70   : > { %v650_v41 = vand.u32 7, %v608_v15  ;;  %v803_v37 = vrot.slane %v801_v19, 4  ;;  %vm752_vm2 = vmpackc.low %vm711_vm0, %vm711_vm0  ;;  %vm4310_vm4 = vcmp.ne.s32.totalorder %v861_v29, %v4180_v17  ;;  %v1635_v29 = vsel %vm4196_vm5, %v4330_v9, 0 }
  0x72   : > { %1583 = vmatpush.bf16.msrb.mxu3 %v3496_v30  ;;  %1790 = vmatpush.bf16.msrb.mxu0 %v3504_v43  ;;  %v3501_v43 = vld [vmem:[#allocation9 + $0xd0] sm:$0xff]  ;;  %vm4300_vm1 = vcmp.ge.s32.totalorder %v650_v41, 1  ;;  %v804_v62 = vor.u32 %v803_v37, %v4202_v32  ;;  %vm4346_vm0 = vcmp.le.s32.totalorder %v650_v41, 6 }
  0x74   : > { %v805_v14 = vrot.slane %v804_v62, 4 }
  0x76   : > { %1584 = vmatpush.bf16.msrb.mxu3 %v3495_v50  ;;  %1791 = vmatpush.bf16.msrb.mxu0 %v3503_v61  ;;  %v760_v61 = vsel %vm752_vm2, 65537, %v3915_v38 }
  0x77   : > { %v811_v8 = vshrl.u32 %v760_v61, 16 }
  0x79   : > { %530 = vmatmul.bf16.gmra.mxu0 %v450_v20  ;;  %540 = vmatmul.bf16.gmra.mxu3 %v452_v21  ;;  %v794_v20 = vor.u32 %v793_v3, %v4162_v2  ;;  %v1291_v21 = vsel %vm1283_vm15, 65537, %v3915_v38  ;;  %vm4276_vm15 = vmpackc.low %vm4258_vm14, %vm4239_vm11  ;;  %v1393_v3 = vunpack.c.l.b16 %v4296_v35  ;;  %vm719_vm14 = vcmp.le.s32.totalorder %v643_v40, 6 }
  0x7a   : > { %v1310_v36 = vshrl.u32 %v1291_v21, 16  ;;  %v1313_v47 = vshll.u32 %v1291_v21, 16  ;;  %1585 = vmatpush.bf16.msrb.mxu3 %v3494_v10  ;;  %v1257_v21 = vld [vmem:[#allocation2 + $0x4] sm:$0xf]  ;;  %v5008_v26 = vsel %vm4276_vm15, 4294967295, %v5007_v26  ;;  %v3491_v10 = vld [vmem:[#allocation9 + $0x80] sm:$0xff]  ;;  %vm753_vm11 = vmpackc.low %vm4300_vm1, %vm4300_vm1 }
  0x7b   : > { %v795_v39 = vrot.slane %v794_v20, 4  ;;  %v3502_v20 = vld [vmem:[#allocation9 + $0xd8] sm:$0xff]  ;;  %vm1286_vm2 = vmpackc.low %vm719_vm14, %vm719_vm14 }
  0x7c   : > { %v1312_v46 = vrot.slane %v1310_v36, 7  ;;  %1792 = vmatpush.bf16.msrb.mxu0 %v3502_v20  ;;  %v3493_v36 = vld [vmem:[#allocation9 + $0x90] sm:$0xff]  ;;  %v4351_v20 = vsel %vm753_vm11, 65537, %v3915_v38  ;;  %vm1287_vm1 = vmpackc.low %vm4346_vm0, %vm4346_vm0 }
  0x7d   : > { %v4235_v55 = vsel %vm4158_vm13, %v795_v39, %v4202_v32  ;;  %v817_v59 = vshll.u32 %v4351_v20, 16  ;;  %vm4393_vm0 = vmpackc.low %vm4310_vm4, %vm4305_vm3  ;;  %v821_v15 = vshrl.u32 %v4351_v20, 16 }
  0x7e   : > { %v1315_v2 = vor.u32 %v1313_v47, %v1312_v46  ;;  %v1317_v11 = vrot.slane %v1312_v46, 4  ;;  %v867_v30 = vunpack.c.l.b16 %v4235_v55  ;;  %v868_v34 = vunpack.c.h.b16 %v4235_v55  ;;  %1586 = vmatpush.bf16.msrb.mxu3 %v3493_v36 }
  0x7f   : > { %v1435_v46 = vsel %vm4276_vm15, %v1257_v21, 0 }
  0x80   : > { %v1316_v22 = vsel %vm4251_vm12, %v1308_v56, %v1315_v2  ;;  %v1325_v39 = vsel %vm4251_vm12, %v1317_v11, %v1324_v12  ;;  %1793 = vmatpush.bf16.msrb.mxu0 %v3501_v43  ;;  %v3492_v56 = vld [vmem:[#allocation9 + $0x88] sm:$0xff]  ;;  %vm4320_vm7 = vcmp.ne.s32.totalorder %v867_v30, %v4177_v13  ;;  %vm4325_vm8 = vcmp.ne.s32.totalorder %v868_v34, %v4180_v17 }
  0x81   : > { %v1379_v44 = vunpack.c.l.b16 %v1316_v22  ;;  %v1380_v45 = vunpack.c.h.b16 %v1316_v22  ;;  %v1386_v52 = vunpack.c.l.b16 %v1325_v39  ;;  %v1387_v58 = vunpack.c.h.b16 %v1325_v39  ;;  %vm4413_vm3 = vmpackc.low %vm4325_vm8, %vm4320_vm7 }
  0x82   : > { %1587 = vmatpush.bf16.msrb.mxu3 %v3492_v56  ;;  %v813_v22 = vrot.slane %v811_v8, 4  ;;  %v1294_v30 = vsel %vm1286_vm2, 65537, %v3915_v38  ;;  %vm4398_vm2 = vcmp.ne.s32.totalorder %v1393_v3, %v4177_v13 }
  0x83   : > { %vm4334_vm9 = vcmp.ne.s32.totalorder %v1379_v44, %v4177_v13  ;;  %vm4339_vm10 = vcmp.ne.s32.totalorder %v1380_v45, %v4180_v17  ;;  %vm4364_vm11 = vcmp.ne.s32.totalorder %v1386_v52, %v4177_v13  ;;  %vm4369_vm14 = vcmp.ne.s32.totalorder %v1387_v58, %v4180_v17 }
  0x84   : > { %1794 = vmatpush.bf16.msrb.mxu0 %v3500_v57  ;;  %v4375_v45 = vrot.slane %v817_v59, 5  ;;  %v1340_v53 = vshll.u32 %v1294_v30, 16  ;;  %vm4434_vm7 = vmpackc.low %vm4339_vm10, %vm4334_vm9 }
  0x85   : > { %vm4475_vm15 = vmpackc.low %vm4369_vm14, %vm4364_vm11 }
  0x86   : > { %1588 = vmatpush.bf16.msrb.mxu3 %v3491_v10 }
  0x88   : > { %1795 = vmatpush.bf16.msrb.mxu0 %v3499_v24  ;;  %v5041_v24 = vmov 0 }
  0x89   : > { %v5042_v24 = vsel %vm4434_vm7, 4294967295, %v5041_v24 }
  0x8c   : > { %2494 = vmatpush.bf16.msra.mxu0 %v3546_v0 }
  0xe6   : > { %v526_v60 = vpop.f32.mrf.mxu0 }
  0xe7   : > { %v550_v4 = vmul.f32 %v4221_v49, %v526_v60  ;;  %v4314_v60 = vunpack.c.l.b16 %v1435_v46  ;;  %v1295_v46 = vsel %vm1287_vm1, 65537, %v3915_v38 }
  0xe8   : > { %v1346_v56 = vshrl.u32 %v1295_v46, 16  ;;  %v1349_v8 = vshll.u32 %v1295_v46, 16 }
  0xe9   : > { %v4281_v28 = vadd.f32 %v4247_v5, %v550_v4  ;;  %v807_v4 = vshll.u32 %v760_v61, 16 }
  0xeb   : > { %v570_v50 = vmax.f32 %v4281_v28, 0.0  ;;  %v809_v21 = vrot.slane %v807_v4, 5  ;;  %v1394_v28 = vunpack.c.h.b16 %v4296_v35  ;;  %v4387_v4 = vrot.slane %v1346_v56, 7 }
  0xec   : > { %v536_v31 = vpop.f32.mrf.mxu3 }
  0xed   : > { %v554_v47 = vmul.f32 %v4221_v49, %v536_v31  ;;  %v810_v40 = vsel %vm4158_vm13, %v805_v14, %v809_v21  ;;  %v814_v41 = vor.u32 %v813_v22, %v809_v21  ;;  %vm4403_vm1 = vcmp.ne.s32.totalorder %v1394_v28, %v4180_v17 }
  0xee   : > { %v528_v48 = vpop.f32.mrf.mxu0  ;;  %v875_v52 = vunpack.c.h.b16 %v810_v40  ;;  %v4427_v22 = vunpack.c.l.b16 %v1635_v29  ;;  %v1351_v59 = vor.u32 %v1349_v8, %v4387_v4  ;;  %vm4509_vm11 = vmpackc.low %vm4403_vm1, %vm4398_vm2 }
  0xef   : > { %v551_v51 = vmul.f32 %v4221_v49, %v528_v48  ;;  %v566_v32 = vadd.f32 %v4247_v5, %v554_v47  ;;  %v1335_v47 = vrot.slane %v4255_v7, 4  ;;  %v815_v37 = vrot.slane %v814_v41, 4  ;;  %v3524_v41 = vld [vmem:[#allocation9 + $0x168] sm:$0xff] }
  0xf0   : > { %vm4423_vm5 = vcmp.ne.s32.totalorder %v875_v52, %v4180_v17  ;;  %v3552_v52 = vld [vmem:[#allocation9 + $0x228] sm:$0xff] }
  0xf1   : > { %v563_v63 = vadd.f32 %v4247_v5, %v551_v51  ;;  %v574_v43 = vmax.f32 %v566_v32, 0.0  ;;  %v874_v51 = vunpack.c.l.b16 %v810_v40  ;;  %v820_v7 = vsel %vm4158_vm13, %v815_v37, %v4375_v45 }
  0xf2   : > { %v881_v62 = vunpack.c.l.b16 %v820_v7  ;;  %v5029_v32 = vmov 0  ;;  %v4464_v37 = vrot.slane %v821_v15, 4 }
  0xf3   : > { %v571_v19 = vmax.f32 %v563_v63, 0.0  ;;  %v882_v63 = vunpack.c.h.b16 %v820_v7  ;;  %v5030_v32 = vsel %vm4393_vm0, 4294967295, %v5029_v32  ;;  %vm4418_vm4 = vcmp.ne.s32.totalorder %v874_v51, %v4177_v13 }
  0xf4   : > { %v538_v23 = vpop.f32.mrf.mxu3  ;;  %vm4443_vm8 = vcmp.ne.s32.totalorder %v881_v62, %v4177_v13  ;;  %v3517_v62 = vld [vmem:[#allocation9 + $0x130] sm:$0xff]  ;;  %vm4519_vm14 = vmpackc.low %vm4423_vm5, %vm4418_vm4  ;;  %v824_v18 = vor.u32 %v4464_v37, %v4375_v45 }
  0xf5   : > { %v3567_v31 = vpack.c.bf16 %v571_v19, %v570_v50  ;;  %v555_v34 = vmul.f32 %v4221_v49, %v538_v23  ;;  %v1337_v50 = vshrl.u32 %v1294_v30, 16  ;;  %v3518_v23 = vld [vmem:[#allocation9 + $0x138] sm:$0xff]  ;;  %v4440_v30 = vadd.s32 48, %v4115_v25 }
  0xf6   : > { %v531_v44 = vpop.f32.mrf.mxu0  ;;  %vm4448_vm9 = vcmp.ne.s32.totalorder %v882_v63, %v4180_v17  ;;  %1938 = vmatpush.bf16.msrb.mxu1 %v3518_v23  ;;  %v3545_v63 = vld [vmem:[#allocation9 + $0x1f0] sm:$0xff]  ;;  %v825_v45 = vrot.slane %v824_v18, 4 }
  0xf7   : > { %3584 = vst [vmem:[#allocation2 + $0x8] sm:$0xff] %v3567_v31   ;;  %v567_v48 = vadd.f32 %v4247_v5, %v555_v34  ;;  %v552_v35 = vmul.f32 %v4221_v49, %v531_v44  ;;  %v1339_v61 = vrot.slane %v1337_v50, 7  ;;  %2495 = vmatpush.bf16.msra.mxu0 %v3545_v63  ;;  %vm4536_vm5 = vmpackc.low %vm4448_vm9, %vm4443_vm8 }
  0xf9   : > { %v575_v57 = vmax.f32 %v567_v48, 0.0  ;;  %v4382_v58 = vadd.f32 %v4247_v5, %v552_v35  ;;  %v1342_v19 = vor.u32 %v1340_v53, %v1339_v61  ;;  %v1344_v28 = vrot.slane %v1339_v61, 4  ;;  %v3526_v61 = vld [vmem:[#allocation9 + $0x178] sm:$0xff] }
  0xfa   : > { %2137 = vmatpush.bf16.msrb.mxu2 %v3526_v61  ;;  %1939 = vmatpush.bf16.msrb.mxu1 %v3517_v62 }
  0xfb   : > { %v3577_v9 = vpack.c.bf16 %v575_v57, %v574_v43  ;;  %v572_v54 = vmax.f32 %v4382_v58, 0.0  ;;  %v4454_v12 = vsel %vm4251_vm12, %v1335_v47, %v1342_v19  ;;  %v4457_v43 = vadd.s32 56, %v4115_v25 }
  0xfc   : > { %v541_v55 = vpop.f32.mrf.mxu3  ;;  %v1352_v8 = vsel %vm4251_vm12, %v1344_v28, %v1351_v59  ;;  %v1400_v36 = vunpack.c.l.b16 %v4454_v12  ;;  %v1401_v19 = vunpack.c.h.b16 %v4454_v12  ;;  %v3525_v59 = vld [vmem:[#allocation9 + $0x170] sm:$0xff] }
  0xfd   : > { %3586 = vst [vmem:[#allocation2 + $0x18] sm:$0xff] %v3577_v9   ;;  %v556_v2 = vmul.f32 %v4221_v49, %v541_v55  ;;  %v657_v55 = vand.u32 7, %v4440_v30  ;;  %v1407_v12 = vunpack.c.l.b16 %v1352_v8  ;;  %v664_v14 = vand.u32 7, %v4457_v43 }
  0xfe   : > { %v533_v29 = vpop.f32.mrf.mxu0  ;;  %v3479_v31 = vld [vmem:[#allocation2 + $0x4] sm:$0xff]  ;;  %v726_v40 = vld [vmem:[#allocation2 + $0xc] sm:$0xf]  ;;  %2138 = vmatpush.bf16.msrb.mxu2 %v3525_v59  ;;  %vm4524_vm2 = vcmp.ne.s32.totalorder %v1400_v36, %v4177_v13  ;;  %vm4542_vm10 = vcmp.ne.s32.totalorder %v1401_v19, %v4180_v17 }
  0xff   : > { %v725_v34 = vld [vmem:[#allocation2 + $0x8] sm:$0xf]  ;;  %v553_v44 = vmul.f32 %v4221_v49, %v533_v29  ;;  %v912_v48 = vsel %vm4413_vm3, %v726_v40, 0  ;;  %v4467_v50 = vadd.f32 %v4247_v5, %v556_v2  ;;  %1220 = vmatmul.bf16.vlgmr.msra.gmra.mxu2 %v3479_v31  ;;  %v4469_v25 = vld [vmem:[#allocation2 + $0xc] sm:$0xf]  ;;  %vm1411_vm1 = vcmp.ne.s32.totalorder %v1407_v12, %v4177_v13 }
 0x100   : > { %v911_v46 = vsel %vm4393_vm0, %v725_v34, 0  ;;  %v1258_v35 = vld [vmem:[#allocation2 + $0x8] sm:$0xf]  ;;  %v954_v51 = vunpack.c.l.b16 %v912_v48  ;;  %v4485_v9 = vld [vmem:[#allocation2 + $0xc] sm:$0xf]  ;;  %v1437_v0 = vsel %vm4475_vm15, %v4469_v25, 0 }
 0x101   : > { %v953_v47 = vunpack.c.l.b16 %v911_v46  ;;  %v1436_v53 = vsel %vm4434_vm7, %v1258_v35, 0  ;;  %v1627_v56 = vld [vmem:[#allocation2 + $0x8] sm:$0xf]  ;;  %v565_v57 = vadd.f32 %v4247_v5, %v553_v44  ;;  %v576_v29 = vmax.f32 %v4467_v50, 0.0 }
 0x102   : > { %v1479_v7 = vunpack.c.l.b16 %v1436_v53  ;;  %v1636_v15 = vsel %vm4204_vm6, %v1627_v56, 0  ;;  %vm713_vm8 = vcmp.ge.s32.totalorder %v657_v55, 1  ;;  %vm4554_vm9 = vcmp.ge.s32.totalorder %v664_v14, 1  ;;  %2139 = vmatpush.bf16.msrb.mxu2 %v3524_v41 }
 0x103   : > { %v961_v39 = vpack.c.b16 %v954_v51, %v953_v47  ;;  %v573_v23 = vmax.f32 %v565_v57, 0.0  ;;  %v1679_v28 = vunpack.c.l.b16 %v1636_v15  ;;  %v1480_v12 = vunpack.c.l.b16 %v1437_v0 }
 0x104   : > { %v4495_v2 = vpack.c.b16 %v1479_v7, %v4314_v60  ;;  %v543_v31 = vpop.f32.mrf.mxu3  ;;  %v1637_v60 = vsel %vm4393_vm0, %v4485_v9, 0  ;;  %v1262_v56 = vld [vmem:[#allocation2 + $0x18] sm:$0xf]  ;;  %vm5063_vm0 = vsmask.f32 4352 }
 0x105   : > { %v975_v34 = vshrl.u32 %v961_v39, 16  ;;  %v978_v40 = vshll.u32 %v961_v39, 16  ;;  %v3572_v44 = vpack.c.bf16 %v573_v23, %v572_v54  ;;  %v557_v46 = vmul.f32 %v4221_v49, %v543_v31  ;;  %v4566_v36 = vld [vmem:[#allocation2 + $0x18] sm:$0xf] }
 0x106   : > { %v1496_v48 = vshll.u32 %v4495_v2, 16  ;;  %v1687_v58 = vpack.c.b16 %v1679_v28, %v4427_v22  ;;  %v1408_v54 = vunpack.c.h.b16 %v1352_v8  ;;  %v1494_v62 = vshrl.u32 %v4495_v2, 16  ;;  %v3516_v23 = vld [vmem:[#allocation9 + $0x128] sm:$0xff]  ;;  %v3523_v28 = vld [vmem:[#allocation9 + $0x160] sm:$0xff] }
 0x107   : > { %v977_v35 = vrot.slane %v975_v34, 3  ;;  %v980_v47 = vrot.slane %v978_v40, 4  ;;  %3585 = vst [vmem:[#allocation2 + $0x10] sm:$0xff] %v3572_v44   ;;  %v569_v49 = vadd.f32 %v4247_v5, %v557_v46  ;;  %v3544_v2 = vld [vmem:[#allocation9 + $0x1e8] sm:$0xff]  ;;  %v1640_v31 = vsel %vm4536_vm5, %v4566_v36, 0  ;;  %1940 = vmatpush.bf16.msrb.mxu1 %v3516_v23  ;;  %2140 = vmatpush.bf16.msrb.mxu2 %v3523_v28  ;;  %v3521_v28 = vld [vmem:[#allocation9 + $0x150] sm:$0xff] }
 0x108   : > { %v1693_v21 = vshrl.u32 %v1687_v58, 16  ;;  %v1696_v20 = vshll.u32 %v1687_v58, 16  ;;  %vm1412_vm4 = vcmp.ne.s32.totalorder %v1408_v54, %v4180_v17  ;;  %v1498_v63 = vrot.slane %v1496_v48, 1  ;;  %2496 = vmatpush.bf16.msra.mxu0 %v3544_v2 }
 0x109   : > { %v4530_v22 = vor.u32 %v980_v47, %v977_v35  ;;  %v577_v53 = vmax.f32 %v569_v49, 0.0  ;;  %vm4546_vm6 = vmpackc.low %vm1412_vm4, %vm1411_vm1  ;;  %v1680_v48 = vunpack.c.l.b16 %v1637_v60 }
 0x10a   : > { %v4564_v8 = vrot.slane %v1693_v21, 3  ;;  %vm754_vm1 = vmpackc.low %vm713_vm8, %vm713_vm8  ;;  %v4568_v9 = vrot.slane %v1696_v20, 4  ;;  %v1499_v44 = vor.u32 %v1498_v63, %v1494_v62  ;;  %v3515_v62 = vld [vmem:[#allocation9 + $0x120] sm:$0xff] }
 0x10b   : > { %v982_v61 = vsel %vm5063_vm0, %v973_v42, %v4530_v22  ;;  %v3582_v39 = vpack.c.bf16 %v577_v53, %v576_v29  ;;  %vm755_vm4 = vmpackc.low %vm4554_vm9, %vm4554_vm9  ;;  %v762_v16 = vsel %vm754_vm1, 65537, %v3915_v38  ;;  %v1440_v42 = vsel %vm4546_vm6, %v1262_v56, 0  ;;  %v3522_v56 = vld [vmem:[#allocation9 + $0x158] sm:$0xff]  ;;  %v3543_v63 = vld [vmem:[#allocation9 + $0x1e0] sm:$0xff]  ;;  %1941 = vmatpush.bf16.msrb.mxu1 %v3515_v62 }
 0x10c   : > { %1070 = vmatmul.bf16.vlgmr.msra.gmra.mxu1 %v982_v61  ;;  %v4579_v15 = vsel %vm755_vm4, 65537, %v3915_v38  ;;  %v827_v19 = vshll.u32 %v762_v16, 16  ;;  %vm4967_vm0 = vsmask.f32 7424  ;;  %vm4585_vm8 = vmpackc.low %vm4542_vm10, %vm4524_vm2  ;;  %v831_v37 = vshrl.u32 %v762_v16, 16  ;;  %2141 = vmatpush.bf16.msrb.mxu2 %v3522_v56 }
 0x10d   : > { %3587 = vst [vmem:[#allocation2 + $0x20] sm:$0xff] %v3582_v39   ;;  %v837_v29 = vshll.u32 %v4579_v15, 16  ;;  %v1699_v10 = vor.u32 %v4568_v9, %v4564_v8  ;;  %v1483_v21 = vunpack.c.l.b16 %v1440_v42  ;;  %vm4613_vm10 = vcmp.le.s32.totalorder %v657_v55, 6  ;;  %2497 = vmatpush.bf16.msra.mxu0 %v3543_v63  ;;  %v3514_v9 = vld [vmem:[#allocation9 + $0x118] sm:$0xff] }
 0x10e   : > { %v3480_v34 = vld [vmem:[#allocation2 + $0xc] sm:$0xff]  ;;  %v829_v35 = vrot.slane %v827_v19, 5  ;;  %v728_v58 = vld [vmem:[#allocation2 + $0x14] sm:$0xf]  ;;  %v833_v16 = vrot.slane %v831_v37, 4 }
 0x10f   : > { %v1260_v40 = vld [vmem:[#allocation2 + $0x10] sm:$0xf]  ;;  %1225 = vmatmul.bf16.gmra.mxu2 %v3480_v34  ;;  %v914_v0 = vsel %vm4536_vm5, %v728_v58, 0  ;;  %v1261_v53 = vld [vmem:[#allocation2 + $0x14] sm:$0xf]  ;;  %v4617_v23 = vrot.slane %v837_v29, 5  ;;  %1942 = vmatpush.bf16.msrb.mxu1 %v3514_v9 }
 0x110   : > { %v727_v46 = vld [vmem:[#allocation2 + $0x10] sm:$0xf]  ;;  %v1438_v47 = vsel %vm4509_vm11, %v1260_v40, 0  ;;  %v956_v57 = vunpack.c.l.b16 %v914_v0  ;;  %v1439_v11 = vsel %vm4585_vm8, %v1261_v53, 0  ;;  %v830_v61 = vsel %vm4158_vm13, %v825_v45, %v829_v35  ;;  %v1630_v0 = vld [vmem:[#allocation2 + $0x14] sm:$0xf]  ;;  %2142 = vmatpush.bf16.msrb.mxu2 %v3521_v28 }
 0x111   : > { %v913_v54 = vsel %vm4519_vm14, %v727_v46, 0  ;;  %v1629_v49 = vld [vmem:[#allocation2 + $0x10] sm:$0xf]  ;;  %v1481_v25 = vunpack.c.l.b16 %v1438_v47  ;;  %v1482_v39 = vunpack.c.l.b16 %v1439_v11  ;;  %v888_v2 = vunpack.c.l.b16 %v830_v61  ;;  %v729_v53 = vld [vmem:[#allocation2 + $0x18] sm:$0xf]  ;;  %v3534_v11 = vld [vmem:[#allocation9 + $0x1b8] sm:$0xff] }
 0x112   : > { %v955_v60 = vunpack.c.l.b16 %v913_v54  ;;  %v1638_v20 = vsel %vm4413_vm3, %v1629_v49, 0  ;;  %v834_v40 = vor.u32 %v833_v16, %v829_v35  ;;  %v1639_v63 = vsel %vm4519_vm14, %v1630_v0, 0  ;;  %2344 = vmatpush.bf16.msra.mxu3 %v3534_v11  ;;  %v3513_v29 = vld [vmem:[#allocation9 + $0x110] sm:$0xff] }
 0x113   : > { %v1681_v41 = vunpack.c.l.b16 %v1638_v20  ;;  %v1488_v36 = vpack.c.b16 %v1481_v25, %v1480_v12  ;;  %v4619_v34 = vpack.c.b16 %v1483_v21, %v1482_v39  ;;  %v889_v12 = vunpack.c.h.b16 %v830_v61  ;;  %1943 = vmatpush.bf16.msrb.mxu1 %v3513_v29  ;;  %v1985_v29 = vld [vmem:[#allocation2 + $0x10] sm:$0xf] }
 0x114   : > { %v962_v42 = vpack.c.b16 %v956_v57, %v955_v60  ;;  %v835_v58 = vrot.slane %v834_v40, 4  ;;  %vm4622_vm2 = vcmp.ne.s32.totalorder %v888_v2, %v4177_v13 }
 0x115   : > { %v1688_v19 = vpack.c.b16 %v1681_v41, %v1680_v48  ;;  %v1501_v45 = vshll.u32 %v1488_v36, 16  ;;  %v1683_v48 = vunpack.c.l.b16 %v1640_v31  ;;  %v1505_v60 = vshrl.u32 %v1488_v36, 16 }
 0x116   : > { %v984_v37 = vshrl.u32 %v962_v42, 16  ;;  %v987_v30 = vshll.u32 %v962_v42, 16  ;;  %v1509_v20 = vshll.u32 %v4619_v34, 16  ;;  %v840_v56 = vsel %vm4158_vm13, %v835_v58, %v4617_v23  ;;  %v730_v42 = vld [vmem:[#allocation2 + $0x1c] sm:$0xf] }
 0x117   : > { %v1701_v55 = vshrl.u32 %v1688_v19, 16  ;;  %v1704_v46 = vshll.u32 %v1688_v19, 16  ;;  %v1503_v47 = vrot.slane %v1501_v45, 1  ;;  %vm893_vm9 = vcmp.ne.s32.totalorder %v889_v12, %v4180_v17  ;;  %v3519_v19 = vld [vmem:[#allocation9 + $0x140] sm:$0xff] }
 0x118   : > { %v986_v54 = vrot.slane %v984_v37, 3  ;;  %v989_v49 = vrot.slane %v987_v30, 4  ;;  %v895_v41 = vunpack.c.l.b16 %v840_v56  ;;  %vm4641_vm4 = vmpackc.low %vm893_vm9, %vm4622_vm2  ;;  %v896_v62 = vunpack.c.h.b16 %v840_v56  ;;  %v4681_v37 = vld [vmem:[#allocation2 + $0x1c] sm:$0xf]  ;;  %v3533_v30 = vld [vmem:[#allocation9 + $0x1b0] sm:$0xff] }
 0x119   : > { %v1703_v25 = vrot.slane %v1701_v55, 3  ;;  %v1706_v21 = vrot.slane %v1704_v46, 4  ;;  %v1504_v35 = vsel %vm4967_vm0, %v1499_v44, %v1503_v47  ;;  %v3520_v44 = vld [vmem:[#allocation9 + $0x148] sm:$0xff]  ;;  %v1507_v61 = vor.u32 %v1505_v60, %v1503_v47  ;;  %2345 = vmatpush.bf16.msra.mxu3 %v3533_v30 }
 0x11a   : > { %1589 = vmatmul.bf16.vlgmr.msrb.gmra.mxu3 %v1504_v35  ;;  %v4631_v57 = vor.u32 %v989_v49, %v986_v54  ;;  %vm4649_vm13 = vcmp.le.s32.totalorder %v664_v14, 6  ;;  %vm5074_vm0 = vsmask.f32 4352  ;;  %vm899_vm9 = vcmp.ne.s32.totalorder %v895_v41, %v4177_v13  ;;  %2143 = vmatpush.bf16.msrb.mxu2 %v3520_v44  ;;  %v3481_v55 = vld [vmem:[#allocation2 + $0x14] sm:$0xff] }
 0x11b   : > { %v4633_v31 = vor.u32 %v1706_v21, %v1703_v25  ;;  %vm5075_vm2 = vmmov %vm5074_vm0  ;;  %v915_v43 = vsel %vm4641_vm4, %v729_v53, 0  ;;  %v4667_v14 = vrot.slane %v1509_v20, 1  ;;  %v1353_v49 = vrot.slane %v4387_v4, 4  ;;  %v1633_v21 = vld [vmem:[#allocation2 + $0x20] sm:$0xf]  ;;  %v3532_v20 = vld [vmem:[#allocation9 + $0x1a8] sm:$0xff] }
 0x11c   : > { %v991_v39 = vsel %vm5074_vm0, %v4530_v22, %v4631_v57  ;;  %vm1289_vm1 = vmpackc.low %vm4649_vm13, %vm4649_vm13  ;;  %vm900_vm0 = vcmp.ne.s32.totalorder %v896_v62, %v4180_v17  ;;  %v1682_v22 = vunpack.c.l.b16 %v1639_v63  ;;  %v957_v28 = vunpack.c.l.b16 %v915_v43  ;;  %v3541_v53 = vld [vmem:[#allocation9 + $0x1d0] sm:$0xff]  ;;  %v3531_v43 = vld [vmem:[#allocation9 + $0x1a0] sm:$0xff] }
 0x11d   : > { %v1708_v16 = vsel %vm5075_vm2, %v1699_v10, %v4633_v31  ;;  %1075 = vmatmul.bf16.gmra.mxu1 %v991_v39  ;;  %vm5076_vm2 = vmpackc.low %vm4613_vm10, %vm4613_vm10  ;;  %v3542_v10 = vld [vmem:[#allocation9 + $0x1d8] sm:$0xff]  ;;  %v1297_v45 = vsel %vm1289_vm1, 65537, %v3915_v38  ;;  %vm5079_vm10 = vsmask.f32 7424  ;;  %v1641_v4 = vsel %vm4641_vm4, %v4681_v37, 0  ;;  %2346 = vmatpush.bf16.msra.mxu3 %v3532_v20 }
 0x11e   : > { %1796 = vmatmul.bf16.vlgmr.msrb.gmra.mxu0 %v1708_v16  ;;  %v1296_v8 = vsel %vm5076_vm2, 65537, %v3915_v38  ;;  %vm4676_vm13 = vmpackc.low %vm900_vm0, %vm899_vm9  ;;  %v1689_v46 = vpack.c.b16 %v1683_v48, %v1682_v22  ;;  %v1364_v47 = vshrl.u32 %v1297_v45, 16  ;;  %v1367_v58 = vshll.u32 %v1297_v45, 16  ;;  %2144 = vmatpush.bf16.msrb.mxu2 %v3519_v19  ;;  %v1263_v45 = vld [vmem:[#allocation2 + $0x1c] sm:$0xf] }
 0x11f   : > { %v1355_v40 = vshrl.u32 %v1296_v8, 16  ;;  %v1358_v12 = vshll.u32 %v1296_v8, 16  ;;  %v916_v18 = vsel %vm4676_vm13, %v730_v42, 0  ;;  %2498 = vmatpush.bf16.msra.mxu0 %v3542_v10  ;;  %v841_v38 = vshrl.u32 %v4579_v15, 16  ;;  %1230 = vmatmul.bf16.gmra.mxu2 %v3481_v55  ;;  %v1983_v37 = vld [vmem:[#allocation2 + $0x8] sm:$0xf] }
 0x120   : > { %v958_v54 = vunpack.c.l.b16 %v916_v18  ;;  %v1512_v0 = vsel %vm5079_vm10, %v1507_v61, %v4667_v14  ;;  %v1710_v35 = vshrl.u32 %v1689_v46, 16  ;;  %v1713_v48 = vshll.u32 %v1689_v46, 16  ;;  %v3512_v61 = vld [vmem:[#allocation9 + $0x108] sm:$0xff]  ;;  %v1264_v55 = vld [vmem:[#allocation2 + $0x20] sm:$0xf]  ;;  %v3511_v46 = vld [vmem:[#allocation9 + $0x100] sm:$0xff] }
 0x121   : > { %v1357_v25 = vrot.slane %v1355_v40, 7  ;;  %v4689_v60 = vrot.slane %v1364_v47, 7  ;;  %v843_v63 = vrot.slane %v841_v38, 4  ;;  %v1642_v42 = vsel %vm4676_vm13, %v1633_v21, 0  ;;  %v1984_v18 = vld [vmem:[#allocation2 + $0xc] sm:$0xf]  ;;  %1944 = vmatpush.bf16.msrb.mxu1 %v3512_v61  ;;  %2347 = vmatpush.bf16.msra.mxu3 %v3531_v43 }
 0x122   : > { %v963_v56 = vpack.c.b16 %v958_v54, %v957_v28  ;;  %v1712_v15 = vrot.slane %v1710_v35, 3  ;;  %v1715_v11 = vrot.slane %v1713_v48, 4  ;;  %vm5080_vm1 = vsmask.f32 4352  ;;  %v1986_v38 = vld [vmem:[#allocation2 + $0x14] sm:$0xf] }
 0x123   : > { %v1360_v41 = vor.u32 %v1358_v12, %v1357_v25  ;;  %v1362_v44 = vrot.slane %v1357_v25, 4  ;;  %v1369_v62 = vor.u32 %v1367_v58, %v4689_v60  ;;  %2499 = vmatpush.bf16.msra.mxu0 %v3541_v53  ;;  %v844_v6 = vor.u32 %v843_v63, %v4617_v23 }
 0x124   : > { %v993_v36 = vshrl.u32 %v963_v56, 16  ;;  %v996_v39 = vshll.u32 %v963_v56, 16  ;;  %v4699_v22 = vor.u32 %v1715_v11, %v1712_v15  ;;  %v1685_v25 = vunpack.c.l.b16 %v1642_v42  ;;  %v3530_v56 = vld [vmem:[#allocation9 + $0x198] sm:$0xff]  ;;  %v731_v11 = vld [vmem:[#allocation2 + $0x20] sm:$0xf] }
 0x125   : > { %v1361_v16 = vsel %vm4251_vm12, %v1353_v49, %v1360_v41  ;;  %v1370_v8 = vsel %vm4251_vm12, %v1362_v44, %v1369_v62  ;;  %v845_v49 = vrot.slane %v844_v6, 4  ;;  %v1993_v53 = vsel %vm4434_vm7, %v1984_v18, 0  ;;  %1945 = vmatpush.bf16.msrb.mxu1 %v3511_v46  ;;  %2348 = vmatpush.bf16.msra.mxu3 %v3530_v56  ;;  %v3539_v6 = vld [vmem:[#allocation9 + $0x1c0] sm:$0xff] }
 0x126   : > { %v1414_v9 = vunpack.c.l.b16 %v1361_v16  ;;  %v1415_v10 = vunpack.c.h.b16 %v1361_v16  ;;  %v995_v19 = vrot.slane %v993_v36, 3  ;;  %v998_v28 = vrot.slane %v996_v39, 4  ;;  %v3540_v36 = vld [vmem:[#allocation9 + $0x1c8] sm:$0xff]  ;;  %v3529_v39 = vld [vmem:[#allocation9 + $0x190] sm:$0xff] }
 0x127   : > { %v1421_v40 = vunpack.c.l.b16 %v1370_v8  ;;  %v1422_v12 = vunpack.c.h.b16 %v1370_v8  ;;  %v1717_v30 = vsel %vm5080_vm1, %v4633_v31, %v4699_v22  ;;  %v1684_v31 = vunpack.c.l.b16 %v1641_v4  ;;  %v3482_v8 = vld [vmem:[#allocation2 + $0x1c] sm:$0xff]  ;;  %2500 = vmatpush.bf16.msra.mxu0 %v3540_v36  ;;  %v2185_v36 = vld [vmem:[#allocation2 + $0x14] sm:$0xf] }
 0x128   : > { %vm1418_vm9 = vcmp.ne.s32.totalorder %v1414_v9, %v4177_v13  ;;  %vm1419_vm0 = vcmp.ne.s32.totalorder %v1415_v10, %v4180_v17  ;;  %v4709_v47 = vor.u32 %v998_v28, %v995_v19  ;;  %v902_v44 = vunpack.c.l.b16 %v845_v49 }
 0x129   : > { %vm4711_vm12 = vmpackc.low %vm1419_vm0, %vm1418_vm9  ;;  %vm1425_vm2 = vcmp.ne.s32.totalorder %v1421_v40, %v4177_v13  ;;  %vm1426_vm10 = vcmp.ne.s32.totalorder %v1422_v12, %v4180_v17  ;;  %vm5085_vm9 = vnez %v5008_v26  ;;  %vm5086_vm0 = vsmask.f32 4352  ;;  %2349 = vmatpush.bf16.msra.mxu3 %v3529_v39 }
 0x12a   : > { %vm4717_vm1 = vmpackc.low %vm1426_vm10, %vm1425_vm2  ;;  %v1441_v23 = vsel %vm4711_vm12, %v1263_v45, 0  ;;  %v1992_v21 = vsel %vm5085_vm9, %v1983_v37, 0  ;;  %1594 = vmatmul.bf16.gmra.mxu3 %v1512_v0  ;;  %v1000_v35 = vsel %vm5086_vm0, %v4631_v57, %v4709_v47  ;;  %v903_v4 = vunpack.c.h.b16 %v845_v49 }
 0x12b   : > { %v1442_v48 = vsel %vm4717_vm1, %v1264_v55, 0  ;;  %v1484_v20 = vunpack.c.l.b16 %v1441_v23  ;;  %v1690_v15 = vpack.c.b16 %v1685_v25, %v1684_v31  ;;  %v1994_v0 = vsel %vm4475_vm15, %v1985_v29, 0  ;;  %v3528_v55 = vld [vmem:[#allocation9 + $0x188] sm:$0xff]  ;;  %v1265_v29 = vld [vmem:[#allocation2 + $0x24] sm:$0x1]  ;;  %2501 = vmatpush.bf16.msra.mxu0 %v3539_v6 }
 0x12c   : > { %v1485_v41 = vunpack.c.l.b16 %v1442_v48  ;;  %v1995_v57 = vsel %vm4509_vm11, %v1986_v38, 0  ;;  %v2035_v62 = vunpack.c.l.b16 %v1992_v21  ;;  %v2036_v63 = vunpack.c.l.b16 %v1993_v53  ;;  %v1634_v23 = vld [vmem:[#allocation2 + $0x24] sm:$0xf]  ;;  %v2182_v6 = vld [vmem:[#allocation2 + $0x8] sm:$0x8] }
 0x12d   : > { %1080 = vmatmul.bf16.gmra.mxu1 %v1000_v35  ;;  %vm906_vm2 = vcmp.ne.s32.totalorder %v902_v44, %v4177_v13  ;;  %vm907_vm10 = vcmp.ne.s32.totalorder %v903_v4, %v4180_v17  ;;  %v1719_v42 = vshrl.u32 %v1690_v15, 16  ;;  %v1722_v43 = vshll.u32 %v1690_v15, 16  ;;  %2350 = vmatpush.bf16.msra.mxu3 %v3528_v55  ;;  %v3527_v35 = vld [vmem:[#allocation9 + $0x180] sm:$0xff]  ;;  %v1987_v4 = vld [vmem:[#allocation2 + $0x18] sm:$0xf] }
 0x12e   : > { %1801 = vmatmul.bf16.gmra.mxu0 %v1717_v30  ;;  %v4736_v61 = vpack.c.b16 %v1485_v41, %v1484_v20  ;;  %vm4740_vm0 = vmpackc.low %vm907_vm10, %vm906_vm2  ;;  %v2037_v10 = vunpack.c.l.b16 %v1994_v0  ;;  %v2038_v19 = vunpack.c.l.b16 %v1995_v57  ;;  %v1371_v28 = vrot.slane %v4689_v60, 4  ;;  %v1988_v15 = vld [vmem:[#allocation2 + $0x1c] sm:$0xf] }
 0x12f   : > { %v917_v9 = vsel %vm4740_vm0, %v731_v11, 0  ;;  %v2044_v40 = vpack.c.b16 %v2036_v63, %v2035_v62  ;;  %1235 = vmatmul.bf16.gmra.mxu2 %v3482_v8  ;;  %v1721_v46 = vrot.slane %v1719_v42, 3  ;;  %v1724_v31 = vrot.slane %v1722_v43, 4  ;;  %v2184_v63 = vld [vmem:[#allocation2 + $0x10] sm:$0xf] }
 0x130   : > { %v959_v45 = vunpack.c.l.b16 %v917_v9  ;;  %v1517_v12 = vshll.u32 %v4736_v61, 16  ;;  %v1428_v37 = vunpack.c.l.b16 %v1371_v28  ;;  %v1429_v30 = vunpack.c.h.b16 %v1371_v28 }
 0x131   : > { %v4748_v49 = vpack.c.b16 %v2038_v19, %v2037_v10  ;;  %v2052_v38 = vshll.u32 %v2044_v40, 16  ;;  %v1513_v48 = vshrl.u32 %v4619_v34, 16  ;;  %v4761_v41 = vor.u32 %v1724_v31, %v1721_v46  ;;  %2351 = vmatpush.bf16.msra.mxu3 %v3527_v35 }
 0x132   : > { %v964_v18 = vpack.c.b16 %v959_v45, %v959_v45  ;;  %vm1432_vm2 = vcmp.ne.s32.totalorder %v1428_v37, %v4177_v13  ;;  %vm1433_vm10 = vcmp.ne.s32.totalorder %v1429_v30, %v4180_v17  ;;  %v1519_v20 = vrot.slane %v1517_v12, 1 }
 0x133   : > { %vm4752_vm9 = vmpackc.low %vm1433_vm10, %vm1432_vm2  ;;  %v1643_v13 = vsel %vm4740_vm0, %v1634_v23, 0  ;;  %v1515_v11 = vor.u32 %v1513_v48, %v4667_v14  ;;  %v2057_v0 = vshll.u32 %v4748_v49, 16  ;;  %v2054_v62 = vrot.slane %v2052_v38, 1 }
 0x134   : > { %v1002_v60 = vshrl.u32 %v964_v18, 16  ;;  %v1005_v25 = vshll.u32 %v964_v18, 16  ;;  %v1443_v53 = vsel %vm4752_vm9, %v1265_v29, 0  ;;  %v1686_v44 = vunpack.c.l.b16 %v1643_v13  ;;  %v3554_v29 = vld [vmem:[#allocation9 + $0x238] sm:$0xff]  ;;  %v1989_v13 = vld [vmem:[#allocation2 + $0x20] sm:$0xf] }
 0x135   : > { %v1486_v57 = vunpack.c.l.b16 %v1443_v53  ;;  %vm5091_vm2 = vsmask.f32 7424  ;;  %v1996_v43 = vsel %vm4585_vm8, %v1987_v4, 0  ;;  %v1997_v8 = vsel %vm4546_vm6, %v1988_v15, 0  ;;  %2693 = vmatpush.bf16.msrb.mxu0 %v3554_v29  ;;  %3596 = vmatpush.bf16.msra.mxu1 %v3554_v29  ;;  %v3553_v4 = vld [vmem:[#allocation9 + $0x230] sm:$0xff] }
 0x136   : > { %v1004_v17 = vrot.slane %v1002_v60, 3  ;;  %v1007_v56 = vrot.slane %v1005_v25, 4  ;;  %v1520_v39 = vsel %vm5091_vm2, %v1515_v11, %v1519_v20  ;;  %v1691_v42 = vpack.c.b16 %v1686_v44, %v1686_v44  ;;  %v2187_v25 = vld [vmem:[#allocation2 + $0x1c] sm:$0xf] }
 0x137   : > { %vm5092_vm10 = vsmask.f32 4352  ;;  %v2050_v9 = vshrl.u32 %v2044_v40, 16  ;;  %v2059_v10 = vrot.slane %v2057_v0, 1  ;;  %v1491_v19 = vpack.c.b16 %v1486_v57, %v1486_v57  ;;  %v2183_v40 = vld [vmem:[#allocation2 + $0xc] sm:$0xf] }
 0x138   : > { %v1008_v34 = vor.u32 %v1007_v56, %v1004_v17  ;;  %v1726_v14 = vsel %vm5092_vm10, %v4699_v22, %v4761_v41  ;;  %vm5093_vm7 = vnez %v5030_v32  ;;  %v2194_v45 = vsel %vm4413_vm3, %v2185_v36, 0  ;;  %vm5094_vm2 = vmmov %vm5092_vm10 }
 0x139   : > { %v2193_v28 = vsel %vm5093_vm7, %v2184_v63, 0  ;;  %v2055_v37 = vor.u32 %v2054_v62, %v2050_v9  ;;  %v2039_v30 = vunpack.c.l.b16 %v1996_v43  ;;  %v2040_v55 = vunpack.c.l.b16 %v1997_v8  ;;  %2694 = vmatpush.bf16.msrb.mxu0 %v3553_v4  ;;  %3597 = vmatpush.bf16.msra.mxu1 %v3553_v4  ;;  %v2189_v62 = vld [vmem:[#allocation2 + $0x24] sm:$0xf]  ;;  %v2190_v63 = vld [vmem:[#allocation2 + $0x28] sm:$0xf] }
 0x13a   : > { %1599 = vmatmul.bf16.gmra.mxu3 %v1520_v39  ;;  %v1009_v12 = vsel %vm5094_vm2, %v4709_v47, %v1008_v34  ;;  %v1728_v18 = vshrl.u32 %v1691_v42, 16  ;;  %v1731_v22 = vshll.u32 %v1691_v42, 16  ;;  %v2236_v46 = vunpack.c.l.b16 %v2193_v28  ;;  %v2186_v47 = vld [vmem:[#allocation2 + $0x18] sm:$0xf]  ;;  %v4795_v39 = vld [vmem:[#allocation2 + $0x24] sm:$0xf] }
 0x13b   : > { %v2237_v31 = vunpack.c.l.b16 %v2194_v45  ;;  %v1521_v32 = vshrl.u32 %v4736_v61, 16  ;;  %vm5095_vm7 = vsmask.f32 7424  ;;  %v1525_v23 = vshll.u32 %v1491_v19, 16 }
 0x13c   : > { %v2060_v3 = vsel %vm5095_vm7, %v2055_v37, %v2059_v10  ;;  %v4781_v38 = vpack.c.b16 %v2040_v55, %v2039_v30  ;;  %v2061_v35 = vshrl.u32 %v4748_v49, 16  ;;  %vm5096_vm3 = vnez %v4996_v27  ;;  %v2188_v49 = vld [vmem:[#allocation2 + $0x20] sm:$0xf]  ;;  %v2541_v55 = vld [vmem:[#allocation2 + $0x14] sm:$0xf] }
 0x13d   : > { %1085 = vmatmul.bf16.gmra.mxu1 %v1009_v12  ;;  %v2244_v60 = vpack.c.b16 %v2237_v31, %v2236_v46  ;;  %v2191_v48 = vsel %vm5096_vm3, %v2182_v6, 0  ;;  %vm5097_vm10 = vnez %v4998_v33  ;;  %v1730_v61 = vrot.slane %v1728_v18, 3  ;;  %v2542_v6 = vld [vmem:[#allocation2 + $0x18] sm:$0xf]  ;;  %2695 = vmatpush.bf16.msrb.mxu0 %v3552_v52 }
 0x13e   : > { %1806 = vmatmul.bf16.gmra.mxu0 %v1726_v14  ;;  %v2192_v53 = vsel %vm5097_vm10, %v2183_v40, 0  ;;  %v1733_v17 = vrot.slane %v1731_v22, 4  ;;  %v1523_v15 = vor.u32 %v1521_v32, %v1519_v20  ;;  %v4788_v11 = vor.u32 %v2061_v35, %v2059_v10  ;;  %v2543_v40 = vld [vmem:[#allocation2 + $0x1c] sm:$0xf]  ;;  %v2544_v32 = vld [vmem:[#allocation2 + $0x20] sm:$0xf]  ;;  %3598 = vmatpush.bf16.msra.mxu1 %v3552_v52 }
 0x13f   : > { %2145 = vmatmul.bf16.vlgmr.msrb.gmra.mxu2 %v2060_v3  ;;  %v2257_v56 = vshrl.u32 %v2244_v60, 16  ;;  %v2260_v44 = vshll.u32 %v2244_v60, 16  ;;  %v2195_v0 = vsel %vm4519_vm14, %v2186_v47, 0  ;;  %v1527_v57 = vrot.slane %v1525_v23, 1  ;;  %vm5098_vm14 = vmmov %vm5095_vm7 }
 0x140   : > { %v2234_v27 = vunpack.c.l.b16 %v2191_v48  ;;  %v2235_v34 = vunpack.c.l.b16 %v2192_v53  ;;  %v2196_v33 = vsel %vm4536_vm5, %v2187_v25, 0  ;;  %v2065_v36 = vshll.u32 %v4781_v38, 16  ;;  %vm5099_vm5 = vmmov %vm5094_vm2  ;;  %v3507_v25 = vld [vmem:[#allocation2 + $0x8] sm:$0xff] }
 0x141   : > { %v1998_v20 = vsel %vm4711_vm12, %v1989_v13, 0  ;;  %v2238_v51 = vunpack.c.l.b16 %v2195_v0  ;;  %v2239_v42 = vunpack.c.l.b16 %v2196_v33  ;;  %v1734_v43 = vor.u32 %v1733_v17, %v1730_v61 }
 0x142   : > { %v2259_v8 = vrot.slane %v2257_v56, 3  ;;  %v2262_v14 = vrot.slane %v2260_v44, 4  ;;  %v2197_v9 = vsel %vm4641_vm4, %v2188_v49, 0  ;;  %v2198_v5 = vsel %vm4676_vm13, %v2189_v62, 0  ;;  %vm5105_vm13 = vmmov %vm5094_vm2 }
 0x143   : > { %v2245_v10 = vpack.c.b16 %v2239_v42, %v2238_v51  ;;  %v2240_v19 = vunpack.c.l.b16 %v2197_v9  ;;  %v2199_v28 = vsel %vm4740_vm0, %v2190_v63, 0  ;;  %v1528_v45 = vsel %vm5098_vm14, %v1523_v15, %v1527_v57  ;;  %v2546_v63 = vld [vmem:[#allocation2 + $0x28] sm:$0xf]  ;;  %v3551_v42 = vld [vmem:[#allocation9 + $0x220] sm:$0xff] }
 0x144   : > { %v2243_v12 = vpack.c.b16 %v2235_v34, %v2234_v27  ;;  %v1999_v37 = vsel %vm4717_vm1, %v4795_v39, 0  ;;  %v2241_v30 = vunpack.c.l.b16 %v2198_v5  ;;  %v4809_v1 = vrot.slane %v2065_v36, 1  ;;  %v2545_v27 = vld [vmem:[#allocation2 + $0x24] sm:$0xf]  ;;  %2696 = vmatpush.bf16.msrb.mxu0 %v3551_v42  ;;  %3599 = vmatpush.bf16.msra.mxu1 %v3551_v42 }
 0x145   : > { %v2266_v18 = vshrl.u32 %v2245_v10, 16  ;;  %v2269_v22 = vshll.u32 %v2245_v10, 16  ;;  %v2242_v2 = vunpack.c.l.b16 %v2199_v28  ;;  %v1735_v16 = vsel %vm5099_vm5, %v4761_v41, %v1734_v43 }
 0x146   : > { %v4813_v46 = vor.u32 %v2262_v14, %v2259_v8  ;;  %v2041_v31 = vunpack.c.l.b16 %v1998_v20  ;;  %v2246_v29 = vpack.c.b16 %v2241_v30, %v2240_v19  ;;  %v2550_v47 = vsel %vm4475_vm15, %v2541_v55, 0  ;;  %vm5100_vm15 = vmmov %vm5094_vm2 }
 0x147   : > { %v2268_v3 = vrot.slane %v2266_v18, 3  ;;  %v2271_v23 = vrot.slane %v2269_v22, 4  ;;  %v2247_v60 = vpack.c.b16 %v2242_v2, %v2242_v2  ;;  %v2551_v53 = vsel %vm4509_vm11, %v2542_v6, 0  ;;  %vm5102_vm11 = vmmov %vm5094_vm2  ;;  %v2547_v2 = vld [vmem:[#allocation2 + $0x2c] sm:$0x1] }
 0x148   : > { %v2275_v35 = vshrl.u32 %v2246_v29, 16  ;;  %v2278_v48 = vshll.u32 %v2246_v29, 16  ;;  %v2552_v41 = vsel %vm4585_vm8, %v2543_v40, 0  ;;  %v2553_v56 = vsel %vm4546_vm6, %v2544_v32, 0  ;;  %vm5101_vm6 = vmmov %vm5095_vm7 }
 0x149   : > { %v2272_v13 = vor.u32 %v2271_v23, %v2268_v3  ;;  %v2284_v61 = vshrl.u32 %v2247_v60, 16  ;;  %v2287_v17 = vshll.u32 %v2247_v60, 16  ;;  %v2249_v44 = vshrl.u32 %v2243_v12, 16  ;;  %vm5103_vm8 = vmmov %vm5094_vm2 }
 0x14a   : > { %1604 = vmatmul.bf16.gmra.mxu3 %v1528_v45  ;;  %v2277_v4 = vrot.slane %v2275_v35, 3  ;;  %v2280_v15 = vrot.slane %v2278_v48, 4  ;;  %v2593_v0 = vunpack.c.l.b16 %v2550_v47  ;;  %v2594_v57 = vunpack.c.l.b16 %v2551_v53  ;;  %vm5104_vm4 = vmmov %vm5101_vm6  ;;  %v3508_v48 = vld [vmem:[#allocation2 + $0x10] sm:$0xff] }
 0x14b   : > { %v4825_v50 = vsel %vm5100_vm15, %v4813_v46, %v2272_v13  ;;  %v2286_v49 = vrot.slane %v2284_v61, 3  ;;  %v2289_v59 = vrot.slane %v2287_v17, 4  ;;  %v2252_v34 = vshll.u32 %v2243_v12, 16  ;;  %v3535_v53 = vld [vmem:[#allocation2 + $0xc] sm:$0xff] }
 0x14c   : > { %v2281_v7 = vor.u32 %v2280_v15, %v2277_v4  ;;  %v2595_v33 = vunpack.c.l.b16 %v2552_v41  ;;  %v2596_v62 = vunpack.c.l.b16 %v2553_v56  ;;  %v2068_v36 = vsel %vm5101_vm6, %v4788_v11, %v4809_v1  ;;  %v3549_v4 = vld [vmem:[#allocation9 + $0x210] sm:$0xff] }
 0x14d   : > { %1946 = vmatmul.bf16.vlgmr.msrb.gmra.mxu1 %v3507_v25  ;;  %v2042_v39 = vunpack.c.l.b16 %v1999_v37  ;;  %v2290_v20 = vor.u32 %v2289_v59, %v2286_v49  ;;  %v2601_v51 = vpack.c.b16 %v2594_v57, %v2593_v0  ;;  %v2554_v14 = vsel %vm4711_vm12, %v2545_v27, 0  ;;  %v1991_v25 = vld [vmem:[#allocation2 + $0x28] sm:$0x1]  ;;  %vm5106_vm12 = vmmov %vm5104_vm4  ;;  %v3548_v59 = vld [vmem:[#allocation9 + $0x208] sm:$0xff] }
 0x14e   : > { %1811 = vmatmul.bf16.gmra.mxu0 %v1735_v16  ;;  %v4831_v43 = vsel %vm5102_vm11, %v2272_v13, %v2281_v7  ;;  %v2602_v8 = vpack.c.b16 %v2596_v62, %v2595_v33  ;;  %v2251_v9 = vrot.slane %v2249_v44, 3  ;;  %v2555_v11 = vsel %vm4717_vm1, %v2546_v63, 0  ;;  %vm5107_vm1 = vmmov %vm5104_vm4  ;;  %v3547_v27 = vld [vmem:[#allocation9 + $0x200] sm:$0xff] }
 0x14f   : > { %2150 = vmatmul.bf16.gmra.mxu2 %v2068_v36  ;;  %v4836_v10 = vsel %vm5103_vm8, %v2281_v7, %v2290_v20  ;;  %v2613_v5 = vshll.u32 %v2601_v51, 16  ;;  %v2254_v19 = vrot.slane %v2252_v34, 4  ;;  %v2597_v45 = vunpack.c.l.b16 %v2554_v14  ;;  %vm5108_vm0 = vmmov %vm5107_vm1  ;;  %v3509_v34 = vld [vmem:[#allocation2 + $0x18] sm:$0xff]  ;;  %v3510_v36 = vld [vmem:[#allocation2 + $0x20] sm:$0xff] }
 0x150   : > { %v2621_v28 = vshll.u32 %v2602_v8, 16  ;;  %v2598_v12 = vunpack.c.l.b16 %v2555_v11  ;;  %v2047_v37 = vpack.c.b16 %v2042_v39, %v2041_v31  ;;  %v2617_v55 = vshrl.u32 %v2601_v51, 16  ;;  %v3536_v7 = vld [vmem:[#allocation2 + $0x14] sm:$0xff]  ;;  %v3537_v39 = vld [vmem:[#allocation2 + $0x1c] sm:$0xff]  ;;  %v2540_v20 = vld [vmem:[#allocation2 + $0x10] sm:$0xf] }
 0x151   : > { %v4840_v30 = vrot.slane %v2613_v5, 1  ;;  %v2625_v58 = vshrl.u32 %v2602_v8, 16  ;;  %v2255_v40 = vor.u32 %v2254_v19, %v2251_v9  ;;  %v2556_v29 = vsel %vm4752_vm9, %v2547_v2, 0  ;;  %v2539_v51 = vld [vmem:[#allocation2 + $0xc] sm:$0xf]  ;;  %vm5112_vm3 = vmmov %vm5108_vm0 }
 0x152   : > { %v2623_v6 = vrot.slane %v2621_v28, 1  ;;  %v2603_v18 = vpack.c.b16 %v2598_v12, %v2597_v45  ;;  %v2069_v32 = vshrl.u32 %v4781_v38, 16  ;;  %v2073_v3 = vshll.u32 %v2047_v37, 16 }
 0x153   : > { %v2619_v22 = vor.u32 %v2617_v55, %v4840_v30  ;;  %v2599_v23 = vunpack.c.l.b16 %v2556_v29  ;;  %v2264_v60 = vsel %vm5105_vm13, %v2255_v40, %v4813_v46  ;;  %v2000_v56 = vsel %vm4752_vm9, %v1991_v25, 0  ;;  %v3550_v46 = vld [vmem:[#allocation9 + $0x218] sm:$0xff]  ;;  %vm5109_vm9 = vmmov %vm5108_vm0 }
 0x154   : > { %v2627_v16 = vor.u32 %v2625_v58, %v2623_v6  ;;  %v2629_v54 = vshll.u32 %v2603_v18, 16  ;;  %v2071_v13 = vor.u32 %v2069_v32, %v4809_v1  ;;  %v2075_v38 = vrot.slane %v2073_v3, 1  ;;  %2697 = vmatpush.bf16.msrb.mxu0 %v3550_v46  ;;  %3600 = vmatpush.bf16.msra.mxu1 %v3550_v46 }
 0x155   : > { %v4847_v31 = vsel %vm5104_vm4, %v2619_v22, %v2623_v6  ;;  %v2604_v35 = vpack.c.b16 %v2599_v23, %v2599_v23  ;;  %v2633_v61 = vshrl.u32 %v2603_v18, 16  ;;  %v2043_v0 = vunpack.c.l.b16 %v2000_v56 }
 0x156   : > { %v2631_v47 = vrot.slane %v2629_v54, 1  ;;  %v2076_v15 = vsel %vm5107_vm1, %v2071_v13, %v2075_v38  ;;  %v2077_v21 = vshrl.u32 %v2047_v37, 16  ;;  %vm5110_vm2 = vnez %v5042_v24 }
 0x157   : > { %v2637_v17 = vshll.u32 %v2604_v35, 16  ;;  %v2048_v1 = vpack.c.b16 %v2043_v0, %v2043_v0  ;;  %v2549_v42 = vsel %vm5110_vm2, %v2540_v20, 0  ;;  %vm5111_vm7 = vnez %v5008_v26 }
 0x158   : > { %v4852_v41 = vsel %vm5106_vm12, %v2627_v16, %v2631_v47  ;;  %v2635_v44 = vor.u32 %v2633_v61, %v2631_v47  ;;  %3601 = vmatpush.bf16.msra.mxu1 %v3549_v4  ;;  %2698 = vmatpush.bf16.msrb.mxu0 %v3549_v4  ;;  %v2079_v33 = vor.u32 %v2077_v21, %v2075_v38  ;;  %v2548_v8 = vsel %vm5111_vm7, %v2539_v51, 0 }
 0x159   : > { %v2639_v52 = vrot.slane %v2637_v17, 1  ;;  %v2081_v57 = vshll.u32 %v2048_v1, 16  ;;  %v2592_v14 = vunpack.c.l.b16 %v2549_v42  ;;  %v2591_v11 = vunpack.c.l.b16 %v2548_v8 }
 0x15a   : > { %2352 = vmatmul.bf16.vlgmr.msra.gmra.mxu3 %v2264_v60 }
 0x15b   : > { %v4859_v49 = vsel %vm5108_vm0, %v2635_v44, %v2639_v52  ;;  %v2083_v62 = vrot.slane %v2081_v57, 1  ;;  %v2600_v28 = vpack.c.b16 %v2592_v14, %v2591_v11 }
 0x15c   : > { %3602 = vmatpush.bf16.msra.mxu1 %v3548_v59  ;;  %2699 = vmatpush.bf16.msrb.mxu0 %v3548_v59 }
 0x15d   : > { %1951 = vmatmul.bf16.gmra.mxu1 %v3508_v48  ;;  %v2084_v63 = vsel %vm5109_vm9, %v2079_v33, %v2083_v62  ;;  %v2608_v45 = vshll.u32 %v2600_v28, 16  ;;  %v2606_v58 = vshrl.u32 %v2600_v28, 16 }
 0x15e   : > { %2502 = vmatmul.bf16.vlgmr.msra.gmra.mxu0 %v3535_v53 }
 0x15f   : > { %2155 = vmatmul.bf16.gmra.mxu2 %v2076_v15  ;;  %v2610_v55 = vrot.slane %v2608_v45, 1 }
 0x160   : > { %3603 = vmatpush.bf16.msra.mxu1 %v3547_v27  ;;  %2700 = vmatpush.bf16.msrb.mxu0 %v3547_v27 }
 0x161   : > { %v2611_v26 = vor.u32 %v2610_v55, %v2606_v58 }
 0x16a   : > { %2357 = vmatmul.bf16.gmra.mxu3 %v4825_v50 }
 0x16d   : > { %1956 = vmatmul.bf16.gmra.mxu1 %v3509_v34 }
 0x16e   : > { %2507 = vmatmul.bf16.gmra.mxu0 %v3536_v7 }
 0x16f   : > { %2160 = vmatmul.bf16.gmra.mxu2 %v2084_v63 }
 0x17a   : > { %2362 = vmatmul.bf16.gmra.mxu3 %v4831_v43  ;;  %v3538_v43 = vld [vmem:[#allocation2 + $0x24] sm:$0xff] }
 0x17d   : > { %1961 = vmatmul.bf16.gmra.mxu1 %v3510_v36  ;;  %v3562_v36 = vld [vmem:[#allocation10 + $0x38] sm:$0xff] }
 0x17e   : > { %2512 = vmatmul.bf16.gmra.mxu0 %v3537_v39  ;;  %2846 = vmatpush.bf16.msra.mxu2 %v3562_v36 }
 0x17f   : > { %3604 = vmatpush.bf16.msrb.mxu3 %v3562_v36 }
 0x182   : > { %v1221_v50 = vpop.f32.mrf.mxu2 }
 0x189   : > { %v1071_v9 = vpop.f32.mrf.mxu1 }
 0x18a   : > { %v1241_v5 = vadd.f32 %v1221_v50, %v1071_v9  ;;  %2367 = vmatmul.bf16.gmra.mxu3 %v4836_v10  ;;  %v1223_v19 = vpop.f32.mrf.mxu2  ;;  %v2616_v10 = vsel %vm5112_vm3, %v2611_v26, %v4840_v30  ;;  %v3561_v9 = vld [vmem:[#allocation10 + $0x30] sm:$0xff] }
 0x18b   : > { %2847 = vmatpush.bf16.msra.mxu2 %v3561_v9  ;;  %3605 = vmatpush.bf16.msrb.mxu3 %v3561_v9 }
 0x18d   : > { %2706 = vmatmul.bf16.vlgmr.msra.gmra.mxu1 %v4847_v31 }
 0x18e   : > { %2517 = vmatmul.bf16.gmra.mxu0 %v3538_v43 }
 0x191   : > { %v1073_v12 = vpop.f32.mrf.mxu1 }
 0x192   : > { %v1242_v37 = vadd.f32 %v1223_v19, %v1073_v12  ;;  %v1226_v24 = vpop.f32.mrf.mxu2 }
 0x19a   : > { %v1076_v6 = vpop.f32.mrf.mxu1  ;;  %v1228_v2 = vpop.f32.mrf.mxu2 }
 0x19b   : > { %v1797_v18 = vpop.f32.mrf.mxu0  ;;  %v1243_v22 = vadd.f32 %v1226_v24, %v1076_v6 }
 0x19d   : > { %2711 = vmatmul.bf16.gmra.mxu1 %v4852_v41  ;;  %v1590_v40 = vpop.f32.mrf.mxu3 }
 0x19e   : > { %2701 = vmatmul.bf16.vlgmr.msrb.gmra.mxu0 %v2616_v10  ;;  %v1610_v16 = vadd.f32 %v1590_v40, %v1241_v5 }
 0x1a0   : > { %v1817_v25 = vadd.f32 %v1797_v18, %v1610_v16 }
 0x1a2   : > { %v1078_v54 = vpop.f32.mrf.mxu1  ;;  %v1231_v3 = vpop.f32.mrf.mxu2 }
 0x1a3   : > { %v1799_v29 = vpop.f32.mrf.mxu0  ;;  %v1244_v32 = vadd.f32 %v1228_v2, %v1078_v54 }
 0x1a5   : > { %v1592_v31 = vpop.f32.mrf.mxu3 }
 0x1a6   : > { %v1611_v23 = vadd.f32 %v1592_v31, %v1242_v37  ;;  %v3560_v37 = vld [vmem:[#allocation10 + $0x28] sm:$0xff] }
 0x1a7   : > { %2848 = vmatpush.bf16.msra.mxu2 %v3560_v37  ;;  %3606 = vmatpush.bf16.msrb.mxu3 %v3560_v37 }
 0x1a8   : > { %v1818_v41 = vadd.f32 %v1799_v29, %v1611_v23 }
 0x1aa   : > { %v1081_v60 = vpop.f32.mrf.mxu1  ;;  %v1233_v53 = vpop.f32.mrf.mxu2 }
 0x1ab   : > { %v1802_v47 = vpop.f32.mrf.mxu0  ;;  %v1245_v35 = vadd.f32 %v1231_v3, %v1081_v60  ;;  %v3558_v3 = vld [vmem:[#allocation10 + $0x18] sm:$0xff] }
 0x1ad   : > { %2716 = vmatmul.bf16.gmra.mxu1 %v4859_v49  ;;  %v1595_v48 = vpop.f32.mrf.mxu3 }
 0x1ae   : > { %v1612_v30 = vadd.f32 %v1595_v48, %v1243_v22  ;;  %v3559_v22 = vld [vmem:[#allocation10 + $0x20] sm:$0xff] }
 0x1af   : > { %2849 = vmatpush.bf16.msra.mxu2 %v3559_v22  ;;  %3607 = vmatpush.bf16.msrb.mxu3 %v3559_v22 }
 0x1b0   : > { %v1819_v46 = vadd.f32 %v1802_v47, %v1612_v30 }
 0x1b2   : > { %v1083_v13 = vpop.f32.mrf.mxu1  ;;  %v1236_v44 = vpop.f32.mrf.mxu2 }
 0x1b3   : > { %v1804_v38 = vpop.f32.mrf.mxu0  ;;  %v1246_v61 = vadd.f32 %v1233_v53, %v1083_v13  ;;  %2850 = vmatpush.bf16.msra.mxu2 %v3558_v3  ;;  %3608 = vmatpush.bf16.msrb.mxu3 %v3558_v3  ;;  %v3557_v13 = vld [vmem:[#allocation10 + $0x10] sm:$0xff] }
 0x1b5   : > { %v1597_v17 = vpop.f32.mrf.mxu3 }
 0x1b6   : > { %v1613_v56 = vadd.f32 %v1597_v17, %v1244_v32 }
 0x1b7   : > { %2851 = vmatpush.bf16.msra.mxu2 %v3557_v13  ;;  %3609 = vmatpush.bf16.msrb.mxu3 %v3557_v13 }
 0x1b8   : > { %v1820_v59 = vadd.f32 %v1804_v38, %v1613_v56 }
 0x1ba   : > { %v1086_v52 = vpop.f32.mrf.mxu1  ;;  %v1238_v7 = vpop.f32.mrf.mxu2 }
 0x1bb   : > { %v1807_v4 = vpop.f32.mrf.mxu0  ;;  %v1247_v15 = vadd.f32 %v1236_v44, %v1086_v52 }
 0x1bd   : > { %v1600_v0 = vpop.f32.mrf.mxu3 }
 0x1be   : > { %v1614_v1 = vadd.f32 %v1600_v0, %v1245_v35 }
 0x1c0   : > { %v1821_v34 = vadd.f32 %v1807_v4, %v1614_v1  ;;  %v3556_v4 = vld [vmem:[#allocation10 + $0x8] sm:$0xff] }
 0x1c1   : > { %2852 = vmatpush.bf16.msra.mxu2 %v3556_v4  ;;  %3610 = vmatpush.bf16.msrb.mxu3 %v3556_v4 }
 0x1c2   : > { %v1088_v21 = vpop.f32.mrf.mxu1  ;;  %v2146_v8 = vpop.f32.mrf.mxu2 }
 0x1c3   : > { %v1809_v57 = vpop.f32.mrf.mxu0  ;;  %v1248_v43 = vadd.f32 %v1238_v7, %v1088_v21 }
 0x1c5   : > { %v1602_v49 = vpop.f32.mrf.mxu3 }
 0x1c6   : > { %v1615_v27 = vadd.f32 %v1602_v49, %v1246_v61 }
 0x1c8   : > { %v1822_v50 = vadd.f32 %v1809_v57, %v1615_v27  ;;  %v3555_v57 = vld [vmem:[#allocation10] sm:$0xff] }
 0x1c9   : > { %2853 = vmatpush.bf16.msra.mxu2 %v3555_v57  ;;  %3611 = vmatpush.bf16.msrb.mxu3 %v3555_v57 }
 0x1ca   : > { %v1947_v62 = vpop.f32.mrf.mxu1  ;;  %v4878_v24 = vpop.f32.mrf.mxu2 }
 0x1cb   : > { %v1812_v33 = vpop.f32.mrf.mxu0  ;;  %v1967_v63 = vadd.f32 %v1947_v62, %v1817_v25  ;;  %v3699_v62 = vld [vmem:[%s4956_s5] ss:$0 sm:$0xff] }
 0x1cd   : > { %v1605_v39 = vpop.f32.mrf.mxu3  ;;  %v2166_v23 = vadd.f32 %v2146_v8, %v1967_v63 }
 0x1ce   : > { %v1616_v20 = vadd.f32 %v1605_v39, %v1247_v15 }
 0x1d0   : > { %v4876_v11 = vadd.f32 %v1812_v33, %v1616_v20 }
 0x1d2   : > { %v1949_v42 = vpop.f32.mrf.mxu1  ;;  %v2151_v2 = vpop.f32.mrf.mxu2 }
 0x1d3   : > { %v1814_v51 = vpop.f32.mrf.mxu0  ;;  %v4874_v14 = vadd.f32 %v1949_v42, %v1818_v41 }
 0x1d5   : > { %v1607_v5 = vpop.f32.mrf.mxu3  ;;  %v2167_v42 = vadd.f32 %v4878_v24, %v4874_v14 }
 0x1d6   : > { %v1617_v19 = vadd.f32 %v1607_v5, %v1248_v43 }
 0x1d8   : > { %v4880_v58 = vadd.f32 %v1814_v51, %v1617_v19  ;;  %v3700_v51 = vld [vmem:[%s4957_s6] ss:$0 sm:$0xff] }
 0x1da   : > { %v1952_v28 = vpop.f32.mrf.mxu1  ;;  %v2153_v47 = vpop.f32.mrf.mxu2 }
 0x1db   : > { %v2503_v45 = vpop.f32.mrf.mxu0  ;;  %v1969_v12 = vadd.f32 %v1952_v28, %v1819_v46 }
 0x1dd   : > { %v2353_v55 = vpop.f32.mrf.mxu3  ;;  %v2168_v29 = vadd.f32 %v2151_v2, %v1969_v12 }
 0x1de   : > { %v2373_v25 = vadd.f32 %v2353_v55, %v2166_v23 }
 0x1e0   : > { %v2523_v38 = vadd.f32 %v2503_v45, %v2373_v25 }
 0x1e2   : > { %v1954_v26 = vpop.f32.mrf.mxu1  ;;  %v2156_v17 = vpop.f32.mrf.mxu2 }
 0x1e3   : > { %v4882_v6 = vpop.f32.mrf.mxu0  ;;  %v1970_v18 = vadd.f32 %v1954_v26, %v1820_v59 }
 0x1e5   : > { %v2355_v10 = vpop.f32.mrf.mxu3  ;;  %v2169_v21 = vadd.f32 %v2153_v47, %v1970_v18 }
 0x1e6   : > { %v2374_v28 = vadd.f32 %v2355_v10, %v2167_v42 }
 0x1e8   : > { %v2524_v14 = vadd.f32 %v4882_v6, %v2374_v28 }
 0x1ea   : > { %v1957_v40 = vpop.f32.mrf.mxu1  ;;  %v2158_v36 = vpop.f32.mrf.mxu2 }
 0x1eb   : > { %v2508_v16 = vpop.f32.mrf.mxu0  ;;  %v1971_v54 = vadd.f32 %v1957_v40, %v1821_v34 }
 0x1ed   : > { %v2358_v32 = vpop.f32.mrf.mxu3  ;;  %v2170_v56 = vadd.f32 %v2156_v17, %v1971_v54 }
 0x1ee   : > { %v2375_v31 = vadd.f32 %v2358_v32, %v2168_v29 }
 0x1f0   : > { %v2525_v60 = vadd.f32 %v2508_v16, %v2375_v31 }
 0x1f2   : > { %v1959_v35 = vpop.f32.mrf.mxu1  ;;  %v2161_v18 = vpop.f32.mrf.mxu2 }
 0x1f3   : > { %v2510_v48 = vpop.f32.mrf.mxu0  ;;  %v1972_v30 = vadd.f32 %v1959_v35, %v1822_v50 }
 0x1f5   : > { %v2360_v53 = vpop.f32.mrf.mxu3  ;;  %v2171_v8 = vadd.f32 %v2158_v36, %v1972_v30 }
 0x1f6   : > { %v2376_v49 = vadd.f32 %v2360_v53, %v2169_v21 }
 0x1f8   : > { %v2526_v27 = vadd.f32 %v2510_v48, %v2376_v49 }
 0x1fa   : > { %v1962_v41 = vpop.f32.mrf.mxu1  ;;  %v2163_v53 = vpop.f32.mrf.mxu2 }
 0x1fb   : > { %v2513_v61 = vpop.f32.mrf.mxu0  ;;  %v1973_v2 = vadd.f32 %v1962_v41, %v4876_v11 }
 0x1fd   : > { %v2363_v46 = vpop.f32.mrf.mxu3  ;;  %v2172_v10 = vadd.f32 %v2161_v18, %v1973_v2  ;;  %v3705_v18 = vld [vmem:[%s4089_s22 + $0x10] sm:$0xff] }
 0x1fe   : > { %v2377_v44 = vadd.f32 %v2363_v46, %v2170_v56  ;;  %v3706_v2 = vld [vmem:[%s4089_s22 + $0x30] sm:$0xff] }
 0x200   : > { %v2527_v52 = vadd.f32 %v2513_v61, %v2377_v44 }
 0x202   : > { %v1964_v15 = vpop.f32.mrf.mxu1 }
 0x203   : > { %v2515_v0 = vpop.f32.mrf.mxu0  ;;  %v1974_v35 = vadd.f32 %v1964_v15, %v4880_v58 }
 0x205   : > { %v2365_v39 = vpop.f32.mrf.mxu3  ;;  %v2173_v56 = vadd.f32 %v2163_v53, %v1974_v35  ;;  %v3709_v53 = vld [vmem:[%s4089_s22 + $0x20] sm:$0xff] }
 0x206   : > { %v2378_v45 = vadd.f32 %v2365_v39, %v2171_v8 }
 0x208   : > { %v2528_v24 = vadd.f32 %v2515_v0, %v2378_v45 }
 0x20a   : > { %v2707_v59 = vpop.f32.mrf.mxu1 }
 0x20b   : > { %v2518_v1 = vpop.f32.mrf.mxu0  ;;  %v2724_v33 = vadd.f32 %v2707_v59, %v2525_v60 }
 0x20d   : > { %v2752_v20 = vmul.f32 %v3699_v62, %v2724_v33  ;;  %v2368_v40 = vpop.f32.mrf.mxu3 }
 0x20e   : > { %v2379_v48 = vadd.f32 %v2368_v40, %v2172_v10  ;;  %v3707_v10 = vld [vmem:[%s4089_s22 + $0x18] sm:$0xff] }
 0x20f   : > { %v2764_v43 = vadd.f32 %v3700_v51, %v2752_v20  ;;  %v3703_v20 = vld [vmem:[%s4089_s22] sm:$0xff] }
 0x210   : > { %v2529_v44 = vadd.f32 %v2518_v1, %v2379_v48  ;;  %v3701_v1 = vld [vmem:[%s4959_s8] ss:$0 sm:$0xff] }
 0x211   : > { %v2772_v55 = vmax.f32 %v2764_v43, 0.0 }
 0x212   : > { %v2709_v7 = vpop.f32.mrf.mxu1 }
 0x213   : > { %v2520_v34 = vpop.f32.mrf.mxu0  ;;  %v2725_v63 = vadd.f32 %v2709_v7, %v2526_v27 }
 0x215   : > { %v2753_v50 = vmul.f32 %v3699_v62, %v2725_v63  ;;  %v2370_v61 = vpop.f32.mrf.mxu3 }
 0x216   : > { %v2380_v4 = vadd.f32 %v2370_v61, %v2173_v56 }
 0x217   : > { %v2765_v19 = vadd.f32 %v3700_v51, %v2753_v50 }
 0x218   : > { %v2530_v21 = vadd.f32 %v2520_v34, %v2380_v4  ;;  %v3702_v34 = vld [vmem:[%s4960_s9] ss:$0 sm:$0xff] }
 0x219   : > { %v2773_v26 = vmax.f32 %v2765_v19, 0.0 }
 0x21a   : > { %v2712_v5 = vpop.f32.mrf.mxu1 }
 0x21b   : > { %v2702_v9 = vpop.f32.mrf.mxu0  ;;  %v2726_v37 = vadd.f32 %v2712_v5, %v2527_v52  ;;  %v2779_v22 = vpack.c.bf16 %v2773_v26, %v2772_v55  ;;  %v3704_v5 = vld [vmem:[%s4089_s22 + $0x8] sm:$0xff] }
 0x21c   : > { %v2722_v12 = vadd.f32 %v2702_v9, %v2523_v38 }
 0x21d   : > { %v2754_v54 = vmul.f32 %v3699_v62, %v2726_v37 }
 0x21e   : > { %v2750_v16 = vmul.f32 %v3699_v62, %v2722_v12 }
 0x21f   : > { %v2766_v25 = vadd.f32 %v3700_v51, %v2754_v54 }
 0x220   : > { %v2762_v23 = vadd.f32 %v3700_v51, %v2750_v16 }
 0x221   : > { %v2774_v41 = vmax.f32 %v2766_v25, 0.0 }
 0x222   : > { %v2714_v32 = vpop.f32.mrf.mxu1  ;;  %v2770_v13 = vmax.f32 %v2762_v23, 0.0 }
 0x223   : > { %v2704_v29 = vpop.f32.mrf.mxu0  ;;  %v2727_v31 = vadd.f32 %v2714_v32, %v2528_v24 }
 0x224   : > { %v2723_v3 = vadd.f32 %v2704_v29, %v2524_v14 }
 0x225   : > { %v2755_v47 = vmul.f32 %v3699_v62, %v2727_v31 }
 0x226   : > { %v2751_v60 = vmul.f32 %v3699_v62, %v2723_v3 }
 0x227   : > { %v2767_v11 = vadd.f32 %v3700_v51, %v2755_v47 }
 0x228   : > { %v2763_v30 = vadd.f32 %v3700_v51, %v2751_v60  ;;  %v3708_v60 = vld [vmem:[%s4089_s22 + $0x38] sm:$0xff] }
 0x229   : > { %v2775_v6 = vmax.f32 %v2767_v11, 0.0 }
 0x22a   : > { %v2771_v38 = vmax.f32 %v2763_v30, 0.0  ;;  %v2717_v17 = vpop.f32.mrf.mxu1 }
 0x22b   : > { %v2780_v52 = vpack.c.bf16 %v2775_v6, %v2774_v41  ;;  %v2728_v0 = vadd.f32 %v2717_v17, %v2529_v44  ;;  %v3710_v17 = vld [vmem:[%s4089_s22 + $0x28] sm:$0xff] }
 0x22c   : > { %v2778_v46 = vpack.c.bf16 %v2771_v38, %v2770_v13 }
 0x22d   : > { %v2756_v59 = vmul.f32 %v3699_v62, %v2728_v0 }
 0x22e   : > { %2854 = vmatmul.bf16.vlgmr.msra.gmra.mxu2 %v2778_v46 }
 0x22f   : > { %v2768_v57 = vadd.f32 %v3700_v51, %v2756_v59 }
 0x231   : > { %v2776_v7 = vmax.f32 %v2768_v57, 0.0 }
 0x232   : > { %v2719_v58 = vpop.f32.mrf.mxu1 }
 0x233   : > { %v2729_v15 = vadd.f32 %v2719_v58, %v2530_v21 }
 0x235   : > { %v2757_v49 = vmul.f32 %v3699_v62, %v2729_v15 }
 0x237   : > { %v2769_v27 = vadd.f32 %v3700_v51, %v2757_v49 }
 0x239   : > { %v2777_v33 = vmax.f32 %v2769_v27, 0.0 }
 0x23b   : > { %v2781_v63 = vpack.c.bf16 %v2777_v33, %v2776_v7 }
 0x23d   : > { %2869 = vmatmul.bf16.vlgmr.msrb.gmra.mxu3 %v2781_v63 }
 0x23e   : > { %2859 = vmatmul.bf16.gmra.mxu2 %v2779_v22 }
 0x24e   : > { %2864 = vmatmul.bf16.gmra.mxu2 %v2780_v52 }
 0x2b1   : > { %v2855_v36 = vpop.f32.mrf.mxu2 }
 0x2b2   : > { %v2879_v62 = vmul.f32 %v3701_v1, %v2855_v36 }
 0x2b4   : > { %v2891_v39 = vadd.f32 %v3702_v34, %v2879_v62 }
 0x2b6   : > { %v2899_v50 = vadd.f32 %v3703_v20, %v2891_v39 }
 0x2b8   : > { %v2907_v51 = vmax.f32 %v2899_v50, 0.0 }
 0x2b9   : > { %v2857_v42 = vpop.f32.mrf.mxu2 }
 0x2ba   : > { %2915 = vst [vmem:[%s4103_s4] sm:$0xff] %v2907_v51  ;;  %v2880_v8 = vmul.f32 %v3701_v1, %v2857_v42 }
 0x2bc   : > { %v2892_v9 = vadd.f32 %v3702_v34, %v2880_v8 }
 0x2be   : > { %v2900_v43 = vadd.f32 %v3704_v5, %v2892_v9 }
 0x2c0   : > { %v2908_v19 = vmax.f32 %v2900_v43, 0.0  ;;  %v2870_v45 = vpop.f32.mrf.mxu3 }
 0x2c1   : > { %v2860_v28 = vpop.f32.mrf.mxu2  ;;  %v2885_v37 = vmul.f32 %v3701_v1, %v2870_v45 }
 0x2c2   : > { %2916 = vst [vmem:[%s4103_s4 + $0x8] sm:$0xff] %v2908_v19  ;;  %v2881_v12 = vmul.f32 %v3701_v1, %v2860_v28 }
 0x2c3   : > { %v2897_v26 = vadd.f32 %v3702_v34, %v2885_v37 }
 0x2c4   : > { %v2893_v55 = vadd.f32 %v3702_v34, %v2881_v12 }
 0x2c5   : > { %v2905_v40 = vadd.f32 %v3706_v2, %v2897_v26 }
 0x2c6   : > { %v2901_v22 = vadd.f32 %v3705_v18, %v2893_v55 }
 0x2c7   : > { %v2913_v54 = vmax.f32 %v2905_v40, 0.0 }
 0x2c8   : > { %v2909_v16 = vmax.f32 %v2901_v22, 0.0  ;;  %v2872_v24 = vpop.f32.mrf.mxu3 }
 0x2c9   : > { %v2862_v14 = vpop.f32.mrf.mxu2  ;;  %v2886_v32 = vmul.f32 %v3701_v1, %v2872_v24  ;;  %2921 = vst [vmem:[%s4103_s4 + $0x30] sm:$0xff] %v2913_v54 }
 0x2ca   : > { %2917 = vst [vmem:[%s4103_s4 + $0x10] sm:$0xff] %v2909_v16  ;;  %v2882_v29 = vmul.f32 %v3701_v1, %v2862_v14 }
 0x2cb   : > { %v2898_v31 = vadd.f32 %v3702_v34, %v2886_v32 }
 0x2cc   : > { %v2894_v3 = vadd.f32 %v3702_v34, %v2882_v29 }
 0x2cd   : > { %v2906_v47 = vadd.f32 %v3708_v60, %v2898_v31 }
 0x2ce   : > { %v2902_v23 = vadd.f32 %v3707_v10, %v2894_v3 }
 0x2cf   : > { %v2914_v35 = vmax.f32 %v2906_v47, 0.0 }
 0x2d0   : > { %v2910_v25 = vmax.f32 %v2902_v23, 0.0 }
 0x2d1   : > { %v2865_v48 = vpop.f32.mrf.mxu2  ;;  %2922 = vst [vmem:[%s4103_s4 + $0x38] sm:$0xff] %v2914_v35 }
 0x2d2   : > { %2918 = vst [vmem:[%s4103_s4 + $0x18] sm:$0xff] %v2910_v25  ;;  %v2883_v30 = vmul.f32 %v3701_v1, %v2865_v48 }
 0x2d4   : > { %v2895_v11 = vadd.f32 %v3702_v34, %v2883_v30 }
 0x2d6   : > { %v2903_v13 = vadd.f32 %v3709_v53, %v2895_v11 }
 0x2d8   : > { %v2911_v38 = vmax.f32 %v2903_v13, 0.0 }
 0x2d9   : > { %v2867_v41 = vpop.f32.mrf.mxu2 }
 0x2da   : > { %2919 = vst [vmem:[%s4103_s4 + $0x20] sm:$0xff] %v2911_v38  ;;  %v2884_v6 = vmul.f32 %v3701_v1, %v2867_v41 }
 0x2dc   : > { %v2896_v61 = vadd.f32 %v3702_v34, %v2884_v6 }
 0x2de   : > { %v2904_v56 = vadd.f32 %v3710_v17, %v2896_v61 }
 0x2e0   : > { %v2912_v46 = vmax.f32 %v2904_v56, 0.0 }
 0x2e2   : > { %2920 = vst [vmem:[%s4103_s4 + $0x28] sm:$0xff] %v2912_v46 }
 0x2e3   : > { %3858 = shalt.err (!%p3855_p13)
}
 0x2e4   : > { %s3916_s25 = smov 128   ;;  %s3917_s22 = smov 8  }
 0x2e5   : > { %3626 = dma.vmem_to_hbm [thread:$0]  (%p4057_p10), %s2937_s18, 1024, %s2939_s29, %s2924_s1, %s3916_s25, %s3916_s25, %s3917_s22  }
 0x2e6 PF: > { %s2953_s4 = sand.u32 1, %s3893_s13   ;;  %p5113_p0 = scmp.ge.s32.totalorder %s3905_s16, 2 }
 0x2e7   : > { %s2954_s24 = scalar_lea.sflag [#allocation6], %s2953_s4 }
 0x2e8   : > { %p3643_p3 = pnand %p5113_p0, %p4008_p6 }
 0x2ea   : > { %p3644_p5 = pneg %p3643_p3 }
 0x2ec   : > { %3888 = dma.done.wait (%p3644_p5), %s2954_s24, 1024  }
 0x2ed   : > { %3890 = vsyncadd (%p3644_p5), %s2954_s24, 4294966272  ;;  %s5114_s12 = sld [smem:[#allocation17_spill]]  ;;  %p25_p7 = scmp.ge.s32.totalorder %s4041_s23, 4  }
 0x2ee   : > { %s5115_s13 = smov %s3897_s14  ;;  %s5116_s14 = smov %s3901_s15 }
 0x2ef   : > { %s5118_s16 = smov %s4041_s23  ;;  %27 = sbr.rel (!%p25_p7) target bundleno = 11 (0xb), region = 129 }
 0x2f3   : > { %s5117_s15 = smov %s5114_s12 }
 0x2f4   :  { %2960 = vsyncpa [#allocation5], 1 }
 0x2f5   :  { %2962 = vsyncpa [#allocation5 + $0x1], 1 }
 0x2f6   :  { %2963 = vsyncpa [#allocation8], 1 }
 0x2f7   :  { %2964 = vsyncpa [#allocation11], 1 }
 0x2f8   :  { %2965 = vsyncpa [#allocation6], 1 }
 0x2f9   :  { %2967 = vsyncpa [#allocation6 + $0x1], 1 }

</bundles_post_ra>
